<compile_context>
chip_gen: v5e
topology: v5e:2x2
jax: 0.10.0
libtpu: 0.0.40
codegen_flags: <defaults>
</compile_context>

<pallas_src>
import functools

import jax
import jax.numpy as jnp
from jax.experimental import pallas as pl
from jax.experimental.pallas import tpu as pltpu

EPS = 1e-5
LANES = 128                    # lane-dense channel padding
MATMUL_DTYPE = jnp.bfloat16    # MXU-native operand dtype


def _round_up(x, m):
    return (x + m - 1) // m * m


# ----------------------------- Pallas kernels ------------------------------
def _conv_taps(xph_ref, w_ref, ksize, stride, Ho, Wo):
    """Conv as ksize^2 accumulated shifted matmuls, f32 accumulator.

    xph_ref: (1, stride*stride, Hp/stride, Wp/stride, Cin)  phase-split, padded
    w_ref:   (ksize*ksize, Cin, Cop)
    returns: (Ho*Wo, Cop) float32
    """
    acc = None
    for di in range(ksize):
        for dj in range(ksize):
            pi, oi = di % stride, di // stride
            pj, oj = dj % stride, dj // stride
            patch = xph_ref[0, pi * stride + pj, oi:oi + Ho, oj:oj + Wo, :]
            lhs = patch.reshape(Ho * Wo, patch.shape[-1])
            contrib = jnp.dot(lhs, w_ref[di * ksize + dj],
                              preferred_element_type=jnp.float32)
            acc = contrib if acc is None else acc + contrib
    return acc


def _conv1_proj_kernel(xph_ref, w1_ref, ws_ref,
                       y1_ref, ys_ref, s1_ref, q1_ref, ss_ref, qs_ref,
                       *, stride):
    """conv1 (3x3, stride) + fused 1x1 projection shortcut (same input tile)
    + per-image per-channel sum / sum^2 partials for the BatchNorms."""
    _, Ho, Wo, Cop = y1_ref.shape
    y1 = _conv_taps(xph_ref, w1_ref, 3, stride, Ho, Wo)
    # the 1x1, stride-s shortcut conv is exactly tap (1,1) of the padded input
    pi, oi = 1 % stride, 1 // stride
    patch = xph_ref[0, pi * stride + pi, oi:oi + Ho, oi:oi + Wo, :]
    ys = jnp.dot(patch.reshape(Ho * Wo, patch.shape[-1]), ws_ref[0],
                 preferred_element_type=jnp.float32)
    y1_ref[0] = y1.reshape(Ho, Wo, Cop)
    ys_ref[0] = ys.reshape(Ho, Wo, Cop)
    s1_ref[0] = jnp.sum(y1, axis=0, keepdims=True)
    q1_ref[0] = jnp.sum(y1 * y1, axis=0, keepdims=True)
    ss_ref[0] = jnp.sum(ys, axis=0, keepdims=True)
    qs_ref[0] = jnp.sum(ys * ys, axis=0, keepdims=True)


def _conv1_id_kernel(xph_ref, w1_ref, y1_ref, s1_ref, q1_ref, *, stride):
    """conv1 only (identity-shortcut path) + BN partials."""
    _, Ho, Wo, Cop = y1_ref.shape
    y1 = _conv_taps(xph_ref, w1_ref, 3, stride, Ho, Wo)
    y1_ref[0] = y1.reshape(Ho, Wo, Cop)
    s1_ref[0] = jnp.sum(y1, axis=0, keepdims=True)
    q1_ref[0] = jnp.sum(y1 * y1, axis=0, keepdims=True)


def _bnrelu_conv2_kernel(y1_ref, w2_ref, s1_ref, b1_ref,
                         y2_ref, s2_ref, q2_ref, pad_scr):
    """relu(bn1(y1)) -> zero-padded bf16 VMEM slab -> conv2 (3x3, stride 1) as
    nine accumulated matmuls + BN partials for bn2."""
    _, Ho, Wo, Cop = y1_ref.shape
    a = y1_ref[0].reshape(Ho * Wo, Cop)
    out1 = jnp.maximum(a * s1_ref[...] + b1_ref[...], 0.0)
    pad_scr[...] = jnp.zeros_like(pad_scr)
    pad_scr[1:1 + Ho, 1:1 + Wo, :] = (
        out1.astype(pad_scr.dtype).reshape(Ho, Wo, Cop))
    acc = None
    for di in range(3):
        for dj in range(3):
            lhs = pad_scr[di:di + Ho, dj:dj + Wo, :].reshape(Ho * Wo, Cop)
            contrib = jnp.dot(lhs, w2_ref[di * 3 + dj],
                              preferred_element_type=jnp.float32)
            acc = contrib if acc is None else acc + contrib
    y2_ref[0] = acc.reshape(Ho, Wo, Cop)
    s2_ref[0] = jnp.sum(acc, axis=0, keepdims=True)
    q2_ref[0] = jnp.sum(acc * acc, axis=0, keepdims=True)


def _bn_add_relu_kernel(y2_ref, sc_ref, s2_ref, b2_ref, ss_ref, bs_ref, o_ref):
    """out = relu(bn2(y2) + bn_s(shortcut)); identity shortcut uses ss=1, bs=0."""
    _, Ho, Wo, Cop = y2_ref.shape
    y2 = y2_ref[0].reshape(Ho * Wo, Cop)
    sc = sc_ref[0].reshape(Ho * Wo, Cop)
    out = jnp.maximum(y2 * s2_ref[...] + b2_ref[...]
                      + sc * ss_ref[...] + bs_ref[...], 0.0)
    o_ref[0] = out.reshape(Ho, Wo, Cop)


# ------------------------------- JAX glue ----------------------------------
def _phase_split(x_nhwc, pad, stride):
    """Zero-pad spatially and split into stride x stride phases so that every
    conv tap becomes a unit-stride static slice inside the kernel.
    (N,H,W,C) -> (N, stride*stride, Hp/stride, Wp/stride, C), bf16. No 9x blowup."""
    N, H, W, C = x_nhwc.shape
    Hp, Wp = H + 2 * pad, W + 2 * pad
    eh, ew = (-Hp) % stride, (-Wp) % stride
    xp = jnp.pad(x_nhwc, ((0, 0), (pad, pad + eh), (pad, pad + ew), (0, 0)))
    Hp, Wp = Hp + eh, Wp + ew
    ph = xp.reshape(N, Hp // stride, stride, Wp // stride, stride, C)
    ph = ph.transpose(0, 2, 4, 1, 3, 5)
    ph = ph.reshape(N, stride * stride, Hp // stride, Wp // stride, C)
    return ph.astype(MATMUL_DTYPE)


def _prep_weight(w, cin_pad, cop):
    """PyTorch conv weight (Co,Ci,kh,kw) -> (kh*kw, cin_pad, cop) bf16 taps."""
    Co, Ci, kh, kw = w.shape
    wt = jnp.transpose(w, (2, 3, 1, 0)).reshape(kh * kw, Ci, Co)
    wt = jnp.pad(wt, ((0, 0), (0, cin_pad - Ci), (0, cop - Co)))
    return wt.astype(MATMUL_DTYPE)


def _bn_scale_shift(sum_p, sq_p, count, gamma, beta, cop):
    """Reduce per-image partials -> per-channel scale/shift (train-mode BN,
    biased variance, var = E[x^2] - E[x]^2 in f32)."""
    tot = jnp.sum(sum_p, axis=(0, 1))
    tot2 = jnp.sum(sq_p, axis=(0, 1))
    mu = tot / count
    var = jnp.maximum(tot2 / count - mu * mu, 0.0)
    g = jnp.pad(gamma.astype(jnp.float32), (0, cop - gamma.shape[0]))
    b = jnp.pad(beta.astype(jnp.float32), (0, cop - beta.shape[0]))
    scale = g * jax.lax.rsqrt(var + EPS)
    shift = b - mu * scale
    return scale.reshape(1, cop), shift.reshape(1, cop)


def _img_spec(shape):
    """Block over the leading (image) axis, full extent elsewhere."""
    nd = len(shape)
    return pl.BlockSpec((1,) + tuple(shape[1:]),
                        lambda n, _nd=nd: (n,) + (0,) * (_nd - 1))


def _rep_spec(shape):
    """Single resident block (weights / BN vectors), same for every image."""
    nd = len(shape)
    return pl.BlockSpec(tuple(shape), lambda n, _nd=nd: (0,) * _nd)


_CPARAMS = pltpu.CompilerParams(
    dimension_semantics=("parallel",),       # megacore sharding on v7x
    vmem_limit_bytes=48 * 1024 * 1024,       # explicit headroom on all gens
)


def basic_block_forward(x_nchw, params, stride):
    """Pallas implementation of BasicBlock.forward (expansion = 1)."""
    x = jnp.transpose(x_nchw, (0, 2, 3, 1)).astype(jnp.float32)   # NCHW -> NHWC
    N, H, W, Cin = x.shape
    planes = params["w1"].shape[0]
    cop = _round_up(planes, LANES)            # lane-dense output channel width
    Ho = (H + 2 - 3) // stride + 1
    Wo = (W + 2 - 3) // stride + 1
    has_proj = (stride != 1) or (Cin != planes)

    xph = _phase_split(x, pad=1, stride=stride)
    w1 = _prep_weight(params["w1"], Cin, cop)

    f32 = jnp.float32
    y_sds = jax.ShapeDtypeStruct((N, Ho, Wo, cop), f32)
    st_sds = jax.ShapeDtypeStruct((N, 1, cop), f32)

    # ---- kernel 1: conv1 (+ fused 1x1 projection shortcut) + BN partials ----
    if has_proj:
        ws = _prep_weight(params["ws"], Cin, cop)
        flops = 2 * N * Ho * Wo * 10 * Cin * cop
        nbytes = ((xph.size + w1.size + ws.size) * 2
                  + (2 * N * Ho * Wo + 4 * N) * cop * 4)
        y1, ysc, s1p, q1p, ssp, qsp = pl.pallas_call(
            functools.partial(_conv1_proj_kernel, stride=stride),
            grid=(N,),
            in_specs=[_img_spec(xph.shape), _rep_spec(w1.shape),
                      _rep_spec(ws.shape)],
            out_specs=(_img_spec(y_sds.shape), _img_spec(y_sds.shape),
                       _img_spec(st_sds.shape), _img_spec(st_sds.shape),
                       _img_spec(st_sds.shape), _img_spec(st_sds.shape)),
            out_shape=(y_sds, y_sds, st_sds, st_sds, st_sds, st_sds),
            compiler_params=_CPARAMS,
            cost_estimate=pl.CostEstimate(flops=flops, transcendentals=0,
                                          bytes_accessed=nbytes),
        )(xph, w1, ws)
    else:
        flops = 2 * N * Ho * Wo * 9 * Cin * cop
        nbytes = ((xph.size + w1.size) * 2
                  + (N * Ho * Wo + 2 * N) * cop * 4)
        y1, s1p, q1p = pl.pallas_call(
            functools.partial(_conv1_id_kernel, stride=stride),
            grid=(N,),
            in_specs=[_img_spec(xph.shape), _rep_spec(w1.shape)],
            out_specs=(_img_spec(y_sds.shape), _img_spec(st_sds.shape),
                       _img_spec(st_sds.shape)),
            out_shape=(y_sds, st_sds, st_sds),
            compiler_params=_CPARAMS,
            cost_estimate=pl.CostEstimate(flops=flops, transcendentals=0,
                                          bytes_accessed=nbytes),
        )(xph, w1)
        # identity shortcut: the (channel-padded) input itself, scale=1 shift=0
        ysc = jnp.pad(x, ((0, 0), (0, 0), (0, 0), (0, cop - Cin)))
        ssp = qsp = None

    count = N * Ho * Wo
    s1, b1 = _bn_scale_shift(s1p, q1p, count, params["g1"], params["b1"], cop)
    if has_proj:
        ss, bs = _bn_scale_shift(ssp, qsp, count,
                                 params["gs"], params["bs"], cop)
    else:
        ss = jnp.ones((1, cop), f32)
        bs = jnp.zeros((1, cop), f32)

    # ---- kernel 2: bn1 + relu + conv2 (3x3, stride 1) + BN partials ---------
    w2 = _prep_weight(params["w2"], cop, cop)
    flops2 = 2 * N * Ho * Wo * 9 * cop * cop
    nbytes2 = y1.size * 4 + w2.size * 2 + (N * Ho * Wo + 2 * N) * cop * 4
    y2, s2p, q2p = pl.pallas_call(
        _bnrelu_conv2_kernel,
        grid=(N,),
        in_specs=[_img_spec(y1.shape), _rep_spec(w2.shape),
                  _rep_spec(s1.shape), _rep_spec(b1.shape)],
        out_specs=(_img_spec(y_sds.shape), _img_spec(st_sds.shape),
                   _img_spec(st_sds.shape)),
        out_shape=(y_sds, st_sds, st_sds),
        scratch_shapes=[pltpu.VMEM((Ho + 2, Wo + 2, cop), MATMUL_DTYPE)],
        compiler_params=_CPARAMS,
        cost_estimate=pl.CostEstimate(flops=flops2, transcendentals=0,
                                      bytes_accessed=nbytes2),
    )(y1, w2, s1, b1)

    s2, b2 = _bn_scale_shift(s2p, q2p, count, params["g2"], params["b2"], cop)

    # ---- kernel 3: bn2 + shortcut-BN + residual add + relu ------------------
    out = pl.pallas_call(
        _bn_add_relu_kernel,
        grid=(N,),
        in_specs=[_img_spec(y2.shape), _img_spec(ysc.shape),
                  _rep_spec(s2.shape), _rep_spec(b2.shape),
                  _rep_spec(ss.shape), _rep_spec(bs.shape)],
        out_specs=_img_spec(y_sds.shape),
        out_shape=y_sds,
        compiler_params=_CPARAMS,
    )(y2, ysc, s2, b2, ss, bs)

    # drop channel padding, NHWC -> NCHW
    return jnp.transpose(out[..., :planes], (0, 3, 1, 2))


# --------------------------- pure-JAX reference -----------------------------
def _ref_conv(x_nhwc, w, stride, pad):
    w_hwio = jnp.transpose(w, (2, 3, 1, 0))
    return jax.lax.conv_general_dilated(
        x_nhwc, w_hwio, (stride, stride), ((pad, pad), (pad, pad)),
        dimension_numbers=("NHWC", "HWIO", "NHWC"))


def _ref_bn(x, g, b):
    mu = jnp.mean(x, axis=(0, 1, 2), keepdims=True)
    var = jnp.mean((x - mu) ** 2, axis=(0, 1, 2), keepdims=True)
    return (x - mu) * jax.lax.rsqrt(var + EPS) * g + b


def basic_block_ref(x_nchw, params, stride):
    x = jnp.transpose(x_nchw, (0, 2, 3, 1)).astype(jnp.float32)
    planes = params["w1"].shape[0]
    out = jax.nn.relu(_ref_bn(_ref_conv(x, params["w1"], stride, 1),
                              params["g1"], params["b1"]))
    out = _ref_bn(_ref_conv(out, params["w2"], 1, 1),
                  params["g2"], params["b2"])
    if stride != 1 or x.shape[-1] != planes:
        sc = _ref_bn(_ref_conv(x, params["ws"], stride, 0),
                     params["gs"], params["bs"])
    else:
        sc = x
    return jnp.transpose(jax.nn.relu(out + sc), (0, 3, 1, 2))


# --------------------------------- main -------------------------------------
if __name__ == "__main__":
    key = jax.random.PRNGKey(0)
    ks = jax.random.split(key, 18)

    # ---- projection-shortcut config: in_planes=4, planes=8, stride=2 --------
    N, Cin, H, W = 2, 4, 16, 16
    planes, stride = 8, 2
    params = {
        "w1": 0.1 * jax.random.normal(ks[0], (planes, Cin, 3, 3), jnp.float32),
        "g1": 1.0 + 0.1 * jax.random.normal(ks[1], (planes,), jnp.float32),
        "b1": 0.05 * jax.random.normal(ks[2], (planes,), jnp.float32),
        "w2": 0.1 * jax.random.normal(ks[3], (planes, planes, 3, 3), jnp.float32),
        "g2": 1.0 + 0.1 * jax.random.normal(ks[4], (planes,), jnp.float32),
        "b2": 0.05 * jax.random.normal(ks[5], (planes,), jnp.float32),
        "ws": 0.1 * jax.random.normal(ks[6], (planes, Cin, 1, 1), jnp.float32),
        "gs": 1.0 + 0.1 * jax.random.normal(ks[7], (planes,), jnp.float32),
        "bs": 0.05 * jax.random.normal(ks[8], (planes,), jnp.float32),
    }
    x = jax.random.normal(ks[9], (N, Cin, H, W), jnp.float32)

    out = jax.block_until_ready(basic_block_forward(x, params, stride))
    ref = jax.block_until_ready(basic_block_ref(x, params, stride))
    assert out.shape == (N, planes, H // stride, W // stride), out.shape
    err = float(jnp.max(jnp.abs(out - ref)))
    assert jnp.allclose(out, ref, atol=8e-2, rtol=8e-2), err   # bf16 operands

    # ---- identity-shortcut config: in_planes=planes=8, stride=1 -------------
    Cin2, planes2, stride2 = 8, 8, 1
    params_id = {
        "w1": 0.1 * jax.random.normal(ks[10], (planes2, Cin2, 3, 3), jnp.float32),
        "g1": 1.0 + 0.1 * jax.random.normal(ks[11], (planes2,), jnp.float32),
        "b1": 0.05 * jax.random.normal(ks[12], (planes2,), jnp.float32),
        "w2": 0.1 * jax.random.normal(ks[13], (planes2, planes2, 3, 3), jnp.float32),
        "g2": 1.0 + 0.1 * jax.random.normal(ks[14], (planes2,), jnp.float32),
        "b2": 0.05 * jax.random.normal(ks[15], (planes2,), jnp.float32),
    }
    x2 = jax.random.normal(ks[16], (N, Cin2, H, W), jnp.float32)

    out2 = jax.block_until_ready(basic_block_forward(x2, params_id, stride2))
    ref2 = jax.block_until_ready(basic_block_ref(x2, params_id, stride2))
    assert out2.shape == (N, planes2, H, W), out2.shape
    err2 = float(jnp.max(jnp.abs(out2 - ref2)))
    assert jnp.allclose(out2, ref2, atol=8e-2, rtol=8e-2), err2

    print("KERNEL_OK")
</pallas_src>

<mosaic_0001>
module attributes {stable_mosaic.version = 11 : i64} {
  func.func @_conv1_proj_kernel(%arg0: i32, %arg1: memref<1x4x9x9x4xbf16, #tpu.memory_space<vmem>>, %arg2: memref<9x4x128xbf16, #tpu.memory_space<vmem>>, %arg3: memref<1x4x128xbf16, #tpu.memory_space<vmem>>, %arg4: memref<1x8x8x128xf32, #tpu.memory_space<vmem>>, %arg5: memref<1x8x8x128xf32, #tpu.memory_space<vmem>>, %arg6: memref<1x1x128xf32, #tpu.memory_space<vmem>>, %arg7: memref<1x1x128xf32, #tpu.memory_space<vmem>>, %arg8: memref<1x1x128xf32, #tpu.memory_space<vmem>>, %arg9: memref<1x1x128xf32, #tpu.memory_space<vmem>>) attributes {dimension_semantics = [#tpu.dimension_semantics<parallel>], iteration_bounds = array<i64: 2>, scalar_prefetch = 0 : i64, scratch_operands = 0 : i64, tpu.core_type = #tpu.core_type<tc>, window_params = [{transform_indices = @transform_0, window_bounds = array<i64: 1, 4, 9, 9, 4>}, {pipeline_mode = #tpu.pipeline_mode<synchronous>, transform_indices = @transform_1, window_bounds = array<i64: 9, 4, 128>}, {pipeline_mode = #tpu.pipeline_mode<synchronous>, transform_indices = @transform_2, window_bounds = array<i64: 1, 4, 128>}, {transform_indices = @transform_3, window_bounds = array<i64: 1, 8, 8, 128>}, {transform_indices = @transform_4, window_bounds = array<i64: 1, 8, 8, 128>}, {transform_indices = @transform_5, window_bounds = array<i64: 1, 1, 128>}, {transform_indices = @transform_6, window_bounds = array<i64: 1, 1, 128>}, {transform_indices = @transform_7, window_bounds = array<i64: 1, 1, 128>}, {transform_indices = @transform_8, window_bounds = array<i64: 1, 1, 128>}]} {
    %c0 = arith.constant 0 : index
    %c0_0 = arith.constant 0 : index
    %c0_1 = arith.constant 0 : index
    %c0_2 = arith.constant 0 : index
    %c0_3 = arith.constant 0 : index
    %0 = vector.load %arg1[%c0, %c0_0, %c0_1, %c0_2, %c0_3] : memref<1x4x9x9x4xbf16, #tpu.memory_space<vmem>>, vector<1x1x8x8x4xbf16>
    %1 = vector.shape_cast %0 : vector<1x1x8x8x4xbf16> to vector<8x8x4xbf16>
    %2 = vector.shape_cast %1 : vector<8x8x4xbf16> to vector<64x4xbf16>
    %c0_4 = arith.constant 0 : index
    %c0_5 = arith.constant 0 : index
    %c0_6 = arith.constant 0 : index
    %3 = vector.load %arg2[%c0_4, %c0_5, %c0_6] : memref<9x4x128xbf16, #tpu.memory_space<vmem>>, vector<1x4x128xbf16>
    %4 = vector.shape_cast %3 : vector<1x4x128xbf16> to vector<4x128xbf16>
    %cst = arith.constant dense<0.000000e+00> : vector<64x128xf32>
    %5 = tpu.matmul %2, %4, %cst {dimension_numbers = #tpu.dot_dimension_numbers<[1], [0], [0], [1], [0, 0, 1, 1], [], []>} : vector<64x4xbf16>, vector<4x128xbf16>, vector<64x128xf32> -> vector<64x128xf32>
    %c0_7 = arith.constant 0 : index
    %c1 = arith.constant 1 : index
    %c0_8 = arith.constant 0 : index
    %c0_9 = arith.constant 0 : index
    %c0_10 = arith.constant 0 : index
    %6 = vector.load %arg1[%c0_7, %c1, %c0_8, %c0_9, %c0_10] : memref<1x4x9x9x4xbf16, #tpu.memory_space<vmem>>, vector<1x1x8x8x4xbf16>
    %7 = vector.shape_cast %6 : vector<1x1x8x8x4xbf16> to vector<8x8x4xbf16>
    %8 = vector.shape_cast %7 : vector<8x8x4xbf16> to vector<64x4xbf16>
    %c1_11 = arith.constant 1 : index
    %c0_12 = arith.constant 0 : index
    %c0_13 = arith.constant 0 : index
    %9 = vector.load %arg2[%c1_11, %c0_12, %c0_13] : memref<9x4x128xbf16, #tpu.memory_space<vmem>>, vector<1x4x128xbf16>
    %10 = vector.shape_cast %9 : vector<1x4x128xbf16> to vector<4x128xbf16>
    %cst_14 = arith.constant dense<0.000000e+00> : vector<64x128xf32>
    %11 = tpu.matmul %8, %10, %cst_14 {dimension_numbers = #tpu.dot_dimension_numbers<[1], [0], [0], [1], [0, 0, 1, 1], [], []>} : vector<64x4xbf16>, vector<4x128xbf16>, vector<64x128xf32> -> vector<64x128xf32>
    %12 = arith.addf %5, %11 : vector<64x128xf32>
    %c0_15 = arith.constant 0 : index
    %c0_16 = arith.constant 0 : index
    %c0_17 = arith.constant 0 : index
    %c1_18 = arith.constant 1 : index
    %c0_19 = arith.constant 0 : index
    %13 = vector.load %arg1[%c0_15, %c0_16, %c0_17, %c1_18, %c0_19] : memref<1x4x9x9x4xbf16, #tpu.memory_space<vmem>>, vector<1x1x8x8x4xbf16>
    %14 = vector.shape_cast %13 : vector<1x1x8x8x4xbf16> to vector<8x8x4xbf16>
    %15 = vector.shape_cast %14 : vector<8x8x4xbf16> to vector<64x4xbf16>
    %c2 = arith.constant 2 : index
    %c0_20 = arith.constant 0 : index
    %c0_21 = arith.constant 0 : index
    %16 = vector.load %arg2[%c2, %c0_20, %c0_21] : memref<9x4x128xbf16, #tpu.memory_space<vmem>>, vector<1x4x128xbf16>
    %17 = vector.shape_cast %16 : vector<1x4x128xbf16> to vector<4x128xbf16>
    %cst_22 = arith.constant dense<0.000000e+00> : vector<64x128xf32>
    %18 = tpu.matmul %15, %17, %cst_22 {dimension_numbers = #tpu.dot_dimension_numbers<[1], [0], [0], [1], [0, 0, 1, 1], [], []>} : vector<64x4xbf16>, vector<4x128xbf16>, vector<64x128xf32> -> vector<64x128xf32>
    %19 = arith.addf %12, %18 : vector<64x128xf32>
    %c0_23 = arith.constant 0 : index
    %c2_24 = arith.constant 2 : index
    %c0_25 = arith.constant 0 : index
    %c0_26 = arith.constant 0 : index
    %c0_27 = arith.constant 0 : index
    %20 = vector.load %arg1[%c0_23, %c2_24, %c0_25, %c0_26, %c0_27] : memref<1x4x9x9x4xbf16, #tpu.memory_space<vmem>>, vector<1x1x8x8x4xbf16>
    %21 = vector.shape_cast %20 : vector<1x1x8x8x4xbf16> to vector<8x8x4xbf16>
    %22 = vector.shape_cast %21 : vector<8x8x4xbf16> to vector<64x4xbf16>
    %c3 = arith.constant 3 : index
    %c0_28 = arith.constant 0 : index
    %c0_29 = arith.constant 0 : index
    %23 = vector.load %arg2[%c3, %c0_28, %c0_29] : memref<9x4x128xbf16, #tpu.memory_space<vmem>>, vector<1x4x128xbf16>
    %24 = vector.shape_cast %23 : vector<1x4x128xbf16> to vector<4x128xbf16>
    %cst_30 = arith.constant dense<0.000000e+00> : vector<64x128xf32>
    %25 = tpu.matmul %22, %24, %cst_30 {dimension_numbers = #tpu.dot_dimension_numbers<[1], [0], [0], [1], [0, 0, 1, 1], [], []>} : vector<64x4xbf16>, vector<4x128xbf16>, vector<64x128xf32> -> vector<64x128xf32>
    %26 = arith.addf %19, %25 : vector<64x128xf32>
    %c0_31 = arith.constant 0 : index
    %c3_32 = arith.constant 3 : index
    %c0_33 = arith.constant 0 : index
    %c0_34 = arith.constant 0 : index
    %c0_35 = arith.constant 0 : index
    %27 = vector.load %arg1[%c0_31, %c3_32, %c0_33, %c0_34, %c0_35] : memref<1x4x9x9x4xbf16, #tpu.memory_space<vmem>>, vector<1x1x8x8x4xbf16>
    %28 = vector.shape_cast %27 : vector<1x1x8x8x4xbf16> to vector<8x8x4xbf16>
    %29 = vector.shape_cast %28 : vector<8x8x4xbf16> to vector<64x4xbf16>
    %c4 = arith.constant 4 : index
    %c0_36 = arith.constant 0 : index
    %c0_37 = arith.constant 0 : index
    %30 = vector.load %arg2[%c4, %c0_36, %c0_37] : memref<9x4x128xbf16, #tpu.memory_space<vmem>>, vector<1x4x128xbf16>
    %31 = vector.shape_cast %30 : vector<1x4x128xbf16> to vector<4x128xbf16>
    %cst_38 = arith.constant dense<0.000000e+00> : vector<64x128xf32>
    %32 = tpu.matmul %29, %31, %cst_38 {dimension_numbers = #tpu.dot_dimension_numbers<[1], [0], [0], [1], [0, 0, 1, 1], [], []>} : vector<64x4xbf16>, vector<4x128xbf16>, vector<64x128xf32> -> vector<64x128xf32>
    %33 = arith.addf %26, %32 : vector<64x128xf32>
    %c0_39 = arith.constant 0 : index
    %c2_40 = arith.constant 2 : index
    %c0_41 = arith.constant 0 : index
    %c1_42 = arith.constant 1 : index
    %c0_43 = arith.constant 0 : index
    %34 = vector.load %arg1[%c0_39, %c2_40, %c0_41, %c1_42, %c0_43] : memref<1x4x9x9x4xbf16, #tpu.memory_space<vmem>>, vector<1x1x8x8x4xbf16>
    %35 = vector.shape_cast %34 : vector<1x1x8x8x4xbf16> to vector<8x8x4xbf16>
    %36 = vector.shape_cast %35 : vector<8x8x4xbf16> to vector<64x4xbf16>
    %c5 = arith.constant 5 : index
    %c0_44 = arith.constant 0 : index
    %c0_45 = arith.constant 0 : index
    %37 = vector.load %arg2[%c5, %c0_44, %c0_45] : memref<9x4x128xbf16, #tpu.memory_space<vmem>>, vector<1x4x128xbf16>
    %38 = vector.shape_cast %37 : vector<1x4x128xbf16> to vector<4x128xbf16>
    %cst_46 = arith.constant dense<0.000000e+00> : vector<64x128xf32>
    %39 = tpu.matmul %36, %38, %cst_46 {dimension_numbers = #tpu.dot_dimension_numbers<[1], [0], [0], [1], [0, 0, 1, 1], [], []>} : vector<64x4xbf16>, vector<4x128xbf16>, vector<64x128xf32> -> vector<64x128xf32>
    %40 = arith.addf %33, %39 : vector<64x128xf32>
    %c0_47 = arith.constant 0 : index
    %c0_48 = arith.constant 0 : index
    %c1_49 = arith.constant 1 : index
    %c0_50 = arith.constant 0 : index
    %c0_51 = arith.constant 0 : index
    %41 = vector.load %arg1[%c0_47, %c0_48, %c1_49, %c0_50, %c0_51] : memref<1x4x9x9x4xbf16, #tpu.memory_space<vmem>>, vector<1x1x8x8x4xbf16>
    %42 = vector.shape_cast %41 : vector<1x1x8x8x4xbf16> to vector<8x8x4xbf16>
    %43 = vector.shape_cast %42 : vector<8x8x4xbf16> to vector<64x4xbf16>
    %c6 = arith.constant 6 : index
    %c0_52 = arith.constant 0 : index
    %c0_53 = arith.constant 0 : index
    %44 = vector.load %arg2[%c6, %c0_52, %c0_53] : memref<9x4x128xbf16, #tpu.memory_space<vmem>>, vector<1x4x128xbf16>
    %45 = vector.shape_cast %44 : vector<1x4x128xbf16> to vector<4x128xbf16>
    %cst_54 = arith.constant dense<0.000000e+00> : vector<64x128xf32>
    %46 = tpu.matmul %43, %45, %cst_54 {dimension_numbers = #tpu.dot_dimension_numbers<[1], [0], [0], [1], [0, 0, 1, 1], [], []>} : vector<64x4xbf16>, vector<4x128xbf16>, vector<64x128xf32> -> vector<64x128xf32>
    %47 = arith.addf %40, %46 : vector<64x128xf32>
    %c0_55 = arith.constant 0 : index
    %c1_56 = arith.constant 1 : index
    %c1_57 = arith.constant 1 : index
    %c0_58 = arith.constant 0 : index
    %c0_59 = arith.constant 0 : index
    %48 = vector.load %arg1[%c0_55, %c1_56, %c1_57, %c0_58, %c0_59] : memref<1x4x9x9x4xbf16, #tpu.memory_space<vmem>>, vector<1x1x8x8x4xbf16>
    %49 = vector.shape_cast %48 : vector<1x1x8x8x4xbf16> to vector<8x8x4xbf16>
    %50 = vector.shape_cast %49 : vector<8x8x4xbf16> to vector<64x4xbf16>
    %c7 = arith.constant 7 : index
    %c0_60 = arith.constant 0 : index
    %c0_61 = arith.constant 0 : index
    %51 = vector.load %arg2[%c7, %c0_60, %c0_61] : memref<9x4x128xbf16, #tpu.memory_space<vmem>>, vector<1x4x128xbf16>
    %52 = vector.shape_cast %51 : vector<1x4x128xbf16> to vector<4x128xbf16>
    %cst_62 = arith.constant dense<0.000000e+00> : vector<64x128xf32>
    %53 = tpu.matmul %50, %52, %cst_62 {dimension_numbers = #tpu.dot_dimension_numbers<[1], [0], [0], [1], [0, 0, 1, 1], [], []>} : vector<64x4xbf16>, vector<4x128xbf16>, vector<64x128xf32> -> vector<64x128xf32>
    %54 = arith.addf %47, %53 : vector<64x128xf32>
    %c0_63 = arith.constant 0 : index
    %c0_64 = arith.constant 0 : index
    %c1_65 = arith.constant 1 : index
    %c1_66 = arith.constant 1 : index
    %c0_67 = arith.constant 0 : index
    %55 = vector.load %arg1[%c0_63, %c0_64, %c1_65, %c1_66, %c0_67] : memref<1x4x9x9x4xbf16, #tpu.memory_space<vmem>>, vector<1x1x8x8x4xbf16>
    %56 = vector.shape_cast %55 : vector<1x1x8x8x4xbf16> to vector<8x8x4xbf16>
    %57 = vector.shape_cast %56 : vector<8x8x4xbf16> to vector<64x4xbf16>
    %c8 = arith.constant 8 : index
    %c0_68 = arith.constant 0 : index
    %c0_69 = arith.constant 0 : index
    %58 = vector.load %arg2[%c8, %c0_68, %c0_69] : memref<9x4x128xbf16, #tpu.memory_space<vmem>>, vector<1x4x128xbf16>
    %59 = vector.shape_cast %58 : vector<1x4x128xbf16> to vector<4x128xbf16>
    %cst_70 = arith.constant dense<0.000000e+00> : vector<64x128xf32>
    %60 = tpu.matmul %57, %59, %cst_70 {dimension_numbers = #tpu.dot_dimension_numbers<[1], [0], [0], [1], [0, 0, 1, 1], [], []>} : vector<64x4xbf16>, vector<4x128xbf16>, vector<64x128xf32> -> vector<64x128xf32>
    %61 = arith.addf %54, %60 : vector<64x128xf32>
    %c0_71 = arith.constant 0 : index
    %c3_72 = arith.constant 3 : index
    %c0_73 = arith.constant 0 : index
    %c0_74 = arith.constant 0 : index
    %c0_75 = arith.constant 0 : index
    %62 = vector.load %arg1[%c0_71, %c3_72, %c0_73, %c0_74, %c0_75] : memref<1x4x9x9x4xbf16, #tpu.memory_space<vmem>>, vector<1x1x8x8x4xbf16>
    %63 = vector.shape_cast %62 : vector<1x1x8x8x4xbf16> to vector<8x8x4xbf16>
    %64 = vector.shape_cast %63 : vector<8x8x4xbf16> to vector<64x4xbf16>
    %c0_76 = arith.constant 0 : index
    %c0_77 = arith.constant 0 : index
    %c0_78 = arith.constant 0 : index
    %65 = vector.load %arg3[%c0_76, %c0_77, %c0_78] : memref<1x4x128xbf16, #tpu.memory_space<vmem>>, vector<1x4x128xbf16>
    %66 = vector.shape_cast %65 : vector<1x4x128xbf16> to vector<4x128xbf16>
    %cst_79 = arith.constant dense<0.000000e+00> : vector<64x128xf32>
    %67 = tpu.matmul %64, %66, %cst_79 {dimension_numbers = #tpu.dot_dimension_numbers<[1], [0], [0], [1], [0, 0, 1, 1], [], []>} : vector<64x4xbf16>, vector<4x128xbf16>, vector<64x128xf32> -> vector<64x128xf32>
    %68 = vector.shape_cast %61 : vector<64x128xf32> to vector<8x8x128xf32>
    %c0_80 = arith.constant 0 : index
    %c0_81 = arith.constant 0 : index
    %c0_82 = arith.constant 0 : index
    %c0_83 = arith.constant 0 : index
    %69 = vector.load %arg4[%c0_80, %c0_81, %c0_82, %c0_83] : memref<1x8x8x128xf32, #tpu.memory_space<vmem>>, vector<1x8x8x128xf32>
    %70 = vector.shape_cast %69 : vector<1x8x8x128xf32> to vector<8x8x128xf32>
    %71 = vector.shape_cast %68 : vector<8x8x128xf32> to vector<1x8x8x128xf32>
    tpu.vector_store %arg4[%c0_80, %c0_81, %c0_82, %c0_83], %71 {strides = array<i32>} : memref<1x8x8x128xf32, #tpu.memory_space<vmem>>, vector<1x8x8x128xf32>,
    %72 = vector.shape_cast %67 : vector<64x128xf32> to vector<8x8x128xf32>
    %c0_84 = arith.constant 0 : index
    %c0_85 = arith.constant 0 : index
    %c0_86 = arith.constant 0 : index
    %c0_87 = arith.constant 0 : index
    %73 = vector.load %arg5[%c0_84, %c0_85, %c0_86, %c0_87] : memref<1x8x8x128xf32, #tpu.memory_space<vmem>>, vector<1x8x8x128xf32>
    %74 = vector.shape_cast %73 : vector<1x8x8x128xf32> to vector<8x8x128xf32>
    %75 = vector.shape_cast %72 : vector<8x8x128xf32> to vector<1x8x8x128xf32>
    tpu.vector_store %arg5[%c0_84, %c0_85, %c0_86, %c0_87], %75 {strides = array<i32>} : memref<1x8x8x128xf32, #tpu.memory_space<vmem>>, vector<1x8x8x128xf32>,
    %cst_88 = arith.constant dense<0.000000e+00> : vector<128xf32>
    %76 = vector.multi_reduction <add>, %61, %cst_88 [0] : vector<64x128xf32> to vector<128xf32>
    %77 = vector.shape_cast %76 : vector<128xf32> to vector<1x128xf32>
    %c0_89 = arith.constant 0 : index
    %c0_90 = arith.constant 0 : index
    %c0_91 = arith.constant 0 : index
    %78 = vector.load %arg6[%c0_89, %c0_90, %c0_91] : memref<1x1x128xf32, #tpu.memory_space<vmem>>, vector<1x1x128xf32>
    %79 = vector.shape_cast %78 : vector<1x1x128xf32> to vector<1x128xf32>
    %80 = vector.shape_cast %77 : vector<1x128xf32> to vector<1x1x128xf32>
    tpu.vector_store %arg6[%c0_89, %c0_90, %c0_91], %80 {strides = array<i32>} : memref<1x1x128xf32, #tpu.memory_space<vmem>>, vector<1x1x128xf32>,
    %81 = arith.mulf %61, %61 : vector<64x128xf32>
    %cst_92 = arith.constant dense<0.000000e+00> : vector<128xf32>
    %82 = vector.multi_reduction <add>, %81, %cst_92 [0] : vector<64x128xf32> to vector<128xf32>
    %83 = vector.shape_cast %82 : vector<128xf32> to vector<1x128xf32>
    %c0_93 = arith.constant 0 : index
    %c0_94 = arith.constant 0 : index
    %c0_95 = arith.constant 0 : index
    %84 = vector.load %arg7[%c0_93, %c0_94, %c0_95] : memref<1x1x128xf32, #tpu.memory_space<vmem>>, vector<1x1x128xf32>
    %85 = vector.shape_cast %84 : vector<1x1x128xf32> to vector<1x128xf32>
    %86 = vector.shape_cast %83 : vector<1x128xf32> to vector<1x1x128xf32>
    tpu.vector_store %arg7[%c0_93, %c0_94, %c0_95], %86 {strides = array<i32>} : memref<1x1x128xf32, #tpu.memory_space<vmem>>, vector<1x1x128xf32>,
    %cst_96 = arith.constant dense<0.000000e+00> : vector<128xf32>
    %87 = vector.multi_reduction <add>, %67, %cst_96 [0] : vector<64x128xf32> to vector<128xf32>
    %88 = vector.shape_cast %87 : vector<128xf32> to vector<1x128xf32>
    %c0_97 = arith.constant 0 : index
    %c0_98 = arith.constant 0 : index
    %c0_99 = arith.constant 0 : index
    %89 = vector.load %arg8[%c0_97, %c0_98, %c0_99] : memref<1x1x128xf32, #tpu.memory_space<vmem>>, vector<1x1x128xf32>
    %90 = vector.shape_cast %89 : vector<1x1x128xf32> to vector<1x128xf32>
    %91 = vector.shape_cast %88 : vector<1x128xf32> to vector<1x1x128xf32>
    tpu.vector_store %arg8[%c0_97, %c0_98, %c0_99], %91 {strides = array<i32>} : memref<1x1x128xf32, #tpu.memory_space<vmem>>, vector<1x1x128xf32>,
    %92 = arith.mulf %67, %67 : vector<64x128xf32>
    %cst_100 = arith.constant dense<0.000000e+00> : vector<128xf32>
    %93 = vector.multi_reduction <add>, %92, %cst_100 [0] : vector<64x128xf32> to vector<128xf32>
    %94 = vector.shape_cast %93 : vector<128xf32> to vector<1x128xf32>
    %c0_101 = arith.constant 0 : index
    %c0_102 = arith.constant 0 : index
    %c0_103 = arith.constant 0 : index
    %95 = vector.load %arg9[%c0_101, %c0_102, %c0_103] : memref<1x1x128xf32, #tpu.memory_space<vmem>>, vector<1x1x128xf32>
    %96 = vector.shape_cast %95 : vector<1x1x128xf32> to vector<1x128xf32>
    %97 = vector.shape_cast %94 : vector<1x128xf32> to vector<1x1x128xf32>
    tpu.vector_store %arg9[%c0_101, %c0_102, %c0_103], %97 {strides = array<i32>} : memref<1x1x128xf32, #tpu.memory_space<vmem>>, vector<1x1x128xf32>,
    return
  }
  func.func @transform_0(%arg0: i32) -> (i32, i32, i32, i32, i32) {
    %c0_i32 = arith.constant 0 : i32
    %c0_i32_0 = arith.constant 0 : i32
    %c0_i32_1 = arith.constant 0 : i32
    %c0_i32_2 = arith.constant 0 : i32
    %c0_i32_3 = arith.constant 0 : i32
    return %arg0, %c0_i32, %c0_i32_0, %c0_i32_1, %c0_i32_2 : i32, i32, i32, i32, i32
  }
  func.func @transform_1(%arg0: i32) -> (i32, i32, i32) {
    %c0_i32 = arith.constant 0 : i32
    %c0_i32_0 = arith.constant 0 : i32
    %c0_i32_1 = arith.constant 0 : i32
    %c0_i32_2 = arith.constant 0 : i32
    return %c0_i32, %c0_i32_0, %c0_i32_1 : i32, i32, i32
  }
  func.func @transform_2(%arg0: i32) -> (i32, i32, i32) {
    %c0_i32 = arith.constant 0 : i32
    %c0_i32_0 = arith.constant 0 : i32
    %c0_i32_1 = arith.constant 0 : i32
    %c0_i32_2 = arith.constant 0 : i32
    return %c0_i32, %c0_i32_0, %c0_i32_1 : i32, i32, i32
  }
  func.func @transform_3(%arg0: i32) -> (i32, i32, i32, i32) {
    %c0_i32 = arith.constant 0 : i32
    %c0_i32_0 = arith.constant 0 : i32
    %c0_i32_1 = arith.constant 0 : i32
    %c0_i32_2 = arith.constant 0 : i32
    return %arg0, %c0_i32, %c0_i32_0, %c0_i32_1 : i32, i32, i32, i32
  }
  func.func @transform_4(%arg0: i32) -> (i32, i32, i32, i32) {
    %c0_i32 = arith.constant 0 : i32
    %c0_i32_0 = arith.constant 0 : i32
    %c0_i32_1 = arith.constant 0 : i32
    %c0_i32_2 = arith.constant 0 : i32
    return %arg0, %c0_i32, %c0_i32_0, %c0_i32_1 : i32, i32, i32, i32
  }
  func.func @transform_5(%arg0: i32) -> (i32, i32, i32) {
    %c0_i32 = arith.constant 0 : i32
    %c0_i32_0 = arith.constant 0 : i32
    %c0_i32_1 = arith.constant 0 : i32
    return %arg0, %c0_i32, %c0_i32_0 : i32, i32, i32
  }
  func.func @transform_6(%arg0: i32) -> (i32, i32, i32) {
    %c0_i32 = arith.constant 0 : i32
    %c0_i32_0 = arith.constant 0 : i32
    %c0_i32_1 = arith.constant 0 : i32
    return %arg0, %c0_i32, %c0_i32_0 : i32, i32, i32
  }
  func.func @transform_7(%arg0: i32) -> (i32, i32, i32) {
    %c0_i32 = arith.constant 0 : i32
    %c0_i32_0 = arith.constant 0 : i32
    %c0_i32_1 = arith.constant 0 : i32
    return %arg0, %c0_i32, %c0_i32_0 : i32, i32, i32
  }
  func.func @transform_8(%arg0: i32) -> (i32, i32, i32) {
    %c0_i32 = arith.constant 0 : i32
    %c0_i32_0 = arith.constant 0 : i32
    %c0_i32_1 = arith.constant 0 : i32
    return %arg0, %c0_i32, %c0_i32_0 : i32, i32, i32
  }
}

</mosaic_0001>

<bundles_post_ra>
// kernel: tpu_custom_call.1
= control target key start
LH: loop header
LB: loop body
LE: loop exit
PB: predicated region body
PF: predicated region fallthrough
CT: control target
= control target key end

     0   :  { %s2958_s0 = inlined_call_operand.vmem [shape: bf16[2,4,9,9,4], index: 0, kind: input, shape index: {}]   ;;  %s2959_s1 = inlined_call_operand.vmem [shape: bf16[9,4,128], index: 1, kind: input, shape index: {}]   ;;  %s2960_s2 = inlined_call_operand.vmem [shape: bf16[1,4,128], index: 2, kind: input, shape index: {}]   ;;  %s2961_s3 = inlined_call_operand.hbm [shape: f32[2,8,8,128], index: 3, kind: output, shape index: {0}]   ;;  %s2962_s4 = inlined_call_operand.hbm [shape: f32[2,8,8,128], index: 4, kind: output, shape index: {1}]   ;;  %s2963_s5 = inlined_call_operand.hbm [shape: f32[2,1,128], index: 5, kind: output, shape index: {2}]   ;;  %s2964_s6 = inlined_call_operand.hbm [shape: f32[2,1,128], index: 6, kind: output, shape index: {3}]   ;;  %s2965_s7 = inlined_call_operand.hbm [shape: f32[2,1,128], index: 7, kind: output, shape index: {4}]   ;;  %s2966_s8 = inlined_call_operand.hbm [shape: f32[2,1,128], index: 8, kind: output, shape index: {5}]  }
   0x1   :  { %2978 = sst [smem:[#allocation18_spill]] %s2958_s0 }
   0x2   :  { %2979 = sst [smem:[#allocation19_spill]] %s2959_s1 }
   0x3   :  { %2980 = sst [smem:[#allocation20_spill]] %s2960_s2 }
   0x4   :  { %14 = vsyncpa [#allocation3], 0 }
   0x5   :  { %16 = vsyncpa [#allocation3 + $0x1], 0 }
   0x6   :  { %17 = vsyncpa [#allocation5], 0 }
   0x7   :  { %19 = vsyncpa [#allocation5 + $0x1], 0 }
   0x8   :  { %20 = vsyncpa [#allocation8], 0 }
   0x9   :  { %22 = vsyncpa [#allocation8 + $0x1], 0 }
   0xa   :  { %23 = vsyncpa [#allocation11], 0 }
   0xb   :  { %25 = vsyncpa [#allocation11 + $0x1], 0  ;;  %s2430_s27 = smov 0   ;;  %s2432_s28 = smov 0  }
   0xc   :  { %s2434_s29 = smov 0   ;;  %s2436_s30 = smov 0  }
   0xd LB: > { %s2451_s9 = sadd.s32 4294967295, %s2381_s30   ;;  %s2967_s10 = sadd.s32 4294967294, %s2381_s30   ;;  %s2381_s30 = sphi %s2436_s30, %s3006_s30   ;;  %s2377_s29 = sphi %s2434_s29, %s3005_s29   ;;  %s2373_s28 = sphi %s2432_s28, %s3004_s28   ;;  %s2369_s27 = sphi %s2430_s27, %s3003_s27  }
   0xe   : > { %s2455_s11 = sadd.s32 1, %s2381_s30   ;;  %s106_s12 = sadd.s32 1, %s2377_s29 }
   0xf   : > { %s103_s13 = ssub.s32 %s2381_s30, %s2455_s11  ;;  %p116_p0 = scmp.ne.s32.totalorder %s2377_s29, %s2373_s28 }
  0x10   : > { %p104_p1 = scmp.eq.s32.totalorder %s103_s13, 0  ;;  %p117_p2 = scmp.eq.s32.totalorder %s2451_s9, 1 }
  0x11   : > { %p122_p3 = scmp.ne.s32.totalorder %s2373_s28, %s2369_s27  ;;  %p123_p4 = scmp.eq.s32.totalorder %s2967_s10, 1 }
  0x12   : > { %s2468_s14 = scalar_select %p104_p1, %s2377_s29, %s106_s12  }
  0x13   : > { %p2470_p5 = por %p117_p2, %p116_p0  ;;  %p2474_p6 = por %p123_p4, %p122_p3 }
  0x14   : > { %p1844_p7 = scmp.ge.s32.totalorder %s2381_s30, 1  ;;  %p285_p8 = scmp.lt.s32.totalorder %s2381_s30, 3 }
  0x16   : > { %p286_p9 = pnand %p1844_p7, %p285_p8 }
  0x18   : > { %289 = sbr.rel (%p286_p9) target bundleno = 414 (0x19e), region = 32 }
  0x1d   : > { %s2983_s1 = sld [smem:[#allocation19_spill]]  ;;  %vm399_vm0 = vcmask 1041408   ;;  %p340_p10 = scmp.lt.s32.totalorder %s2451_s9, 1  ;;  %vm386_vm1 = vcmask 31744   ;;  %vm512_vm2 = vsmask.f32 3328 }
  0x1e   : > { %s2984_s0 = sld [smem:[#allocation18_spill]]  ;;  %vm513_vm3 = vsmask.f32 7440  ;;  %s2968_s22 = sshll.u32 %s2451_s9, 6 }
  0x1f   : > { %s341_s23 = scalar_select %p340_p10, %s2451_s9, 1  ;;  %vm2563_vm4 = vmor %vm512_vm2, %vm513_vm3 }
  0x20   : > { %s2985_s2 = sld [smem:[#allocation20_spill]]  ;;  %s1584_s25 = scalar_lea.hbm %s2962_s4, %s2968_s22 }
  0x21   : > { %s2100_s18 = smul.u32 288, %s341_s23  ;;  %s2969_s26 = sand.u32 1, %s2451_s9  }
  0x22   : > { %s1587_s13 = sshll.u32 %s1584_s25, 4  ;;  %s2788_s17 = scalar_lea.sflag [#allocation5], %s2969_s26  ;;  %s1588_s13 = int_to_ptr.hbm [resolvable:$true] %s1587_s13 }
  0x23   : > { %v1856_v0 = vld [vmem:[%s2983_s1 + $0x2] sm:$0x3]  ;;  %v354_v1 = vld [vmem:[%s2983_s1] sm:$0x3]  ;;  %v1897_v4 = vld [vmem:[%s2983_s1 + $0x4] sm:$0x3] }
  0x24   : > { %v401_v2 = vsel %vm399_vm0, %v1856_v0, 0  ;;  %v465_v3 = vsel %vm399_vm0, %v354_v1, 0  ;;  %v654_v5 = vsel %vm399_vm0, %v1897_v4, 0  ;;  %v1910_v6 = vld [vmem:[%s2983_s1 + $0x6] sm:$0x3]  ;;  %s2509_s21 = scalar_lea.vmem %s2984_s0, %s2100_s18  ;;  %s2747_s18 = sand.u32 1, %s2373_s28  }
  0x25   : > { %2098 = vmatpush.bf16.msra.mxu2 %v401_v2  ;;  %474 = vmatpush.bf16.msra.mxu1 %v465_v3  ;;  %v1939_v7 = vld [vmem:[%s2983_s1 + $0x8] sm:$0x3]  ;;  %v737_v8 = vsel %vm399_vm0, %v1910_v6, 0  ;;  %v1976_v10 = vld [vmem:[%s2983_s1 + $0xa] sm:$0x3]  ;;  %s1845_s19 = sshll.u32 %s2747_s18, 6 }
  0x26   : > { %2099 = vmatpush.bf16.msra.mxu3 %v465_v3  ;;  %410 = vmatpush.bf16.msra.mxu0 %v401_v2  ;;  %v820_v9 = vsel %vm399_vm0, %v1939_v7, 0  ;;  %v1014_v11 = vsel %vm399_vm0, %v1976_v10, 0  ;;  %v1867_v12 = vld [vmem:[%s2509_s21 + $0x68] sm:$0xf]  ;;  %v2078_v13 = vld [vmem:[%s2509_s21 + $0x6c] sm:$0xf0] }
  0x27   : > { %v1879_v14 = vld [vmem:[%s2509_s21] sm:$0xf]  ;;  %v1868_v15 = vor.u32 %v2078_v13, %v1867_v12  ;;  %v2072_v16 = vld [vmem:[%s2509_s21 + $0x4] sm:$0xf0]  ;;  %v2076_v22 = vld [vmem:[%s2509_s21 + $0x4c] sm:$0xf0] }
  0x28   : > { %v1887_v17 = vld [vmem:[%s2509_s21 + $0x20] sm:$0xf]  ;;  %v2074_v18 = vld [vmem:[%s2509_s21 + $0x24] sm:$0xf0]  ;;  %v1880_v19 = vor.u32 %v2072_v16, %v1879_v14  ;;  %v1871_v30 = vld [vmem:[%s2509_s21 + $0x78] sm:$0xf] }
  0x29   : > { %663 = vmatpush.bf16.msrb.mxu2 %v654_v5  ;;  %1023 = vmatpush.bf16.msrb.mxu1 %v1014_v11  ;;  %v1888_v20 = vor.u32 %v2074_v18, %v1887_v17  ;;  %v1859_v21 = vld [vmem:[%s2509_s21 + $0x48] sm:$0xf]  ;;  %v496_v24 = vld [vmem:[%s2509_s21] sm:$0xf]  ;;  %v1960_v32 = vld [vmem:[%s2509_s21 + $0x90] sm:$0xf] }
  0x2a   : > { %746 = vmatpush.bf16.msrb.mxu3 %v737_v8  ;;  %829 = vmatpush.bf16.msrb.mxu0 %v820_v9  ;;  %v1860_v23 = vor.u32 %v2076_v22, %v1859_v21  ;;  %v498_v25 = vld [vmem:[%s2509_s21 + $0x8] sm:$0xf]  ;;  %v516_v26 = vshrl.u32 %v496_v24, 16  ;;  %v519_v27 = vshll.u32 %v496_v24, 16  ;;  %v2079_v31 = vld [vmem:[%s2509_s21 + $0x7c] sm:$0xf0] }
  0x2b   : > { %1875 = vmatmul.msk.bf16.vlgmr.msra.gmra.mxu2 %vm386_vm1, %v1868_v15  ;;  %1893 = vmatmul.msk.bf16.vlgmr.msra.gmra.mxu1 %vm386_vm1, %v1880_v19  ;;  %v530_v28 = vshrl.u32 %v498_v25, 16  ;;  %v533_v29 = vshll.u32 %v498_v25, 16  ;;  %v1883_v33 = vld [vmem:[%s2509_s21 + $0x10] sm:$0xf]  ;;  %v2073_v34 = vld [vmem:[%s2509_s21 + $0x14] sm:$0xf0]  ;;  %v1872_v54 = vor.u32 %v2079_v31, %v1871_v30 }
  0x2c   : > { %1895 = vmatmul.msk.bf16.vlgmr.msra.gmra.mxu3 %vm386_vm1, %v1888_v20  ;;  %1873 = vmatmul.msk.bf16.vlgmr.msra.gmra.mxu0 %vm386_vm1, %v1860_v23  ;;  %v1891_v35 = vld [vmem:[%s2509_s21 + $0x30] sm:$0xf]  ;;  %v2075_v36 = vld [vmem:[%s2509_s21 + $0x34] sm:$0xf0]  ;;  %v497_v37 = vld [vmem:[%s2509_s21 + $0x4] sm:$0x1]  ;;  %v1884_v59 = vor.u32 %v2073_v34, %v1883_v33 }
  0x2d   : > { %v499_v38 = vld [vmem:[%s2509_s21 + $0xc] sm:$0x1]  ;;  %v518_v39 = vrot.slane %v516_v26, 4  ;;  %v521_v40 = vrot.slane %v519_v27, 5  ;;  %v1962_v41 = vld [vmem:[%s2509_s21 + $0x98] sm:$0xf]  ;;  %v1892_v60 = vor.u32 %v2075_v36, %v1891_v35 }
  0x2e   : > { %v876_v42 = vshrl.u32 %v1960_v32, 16  ;;  %v879_v43 = vshll.u32 %v1960_v32, 16  ;;  %v532_v44 = vrot.slane %v530_v28, 4  ;;  %v535_v45 = vrot.slane %v533_v29, 5  ;;  %v1989_v48 = vld [vmem:[%s2983_s1 + $0xc] sm:$0x3] }
  0x2f   : > { %v890_v46 = vshrl.u32 %v1962_v41, 16  ;;  %v893_v47 = vshll.u32 %v1962_v41, 16  ;;  %v1863_v49 = vld [vmem:[%s2509_s21 + $0x58] sm:$0xf]  ;;  %v1961_v50 = vld [vmem:[%s2509_s21 + $0x94] sm:$0x1]  ;;  %v522_v1 = vor.u32 %v521_v40, %v518_v39 }
  0x30   : > { %v1963_v51 = vld [vmem:[%s2509_s21 + $0x9c] sm:$0x1]  ;;  %v878_v52 = vrot.slane %v876_v42, 4  ;;  %v881_v53 = vrot.slane %v879_v43, 5  ;;  %v2077_v55 = vld [vmem:[%s2509_s21 + $0x5c] sm:$0xf0]  ;;  %v536_v2 = vor.u32 %v535_v45, %v532_v44 }
  0x31   : > { %v525_v56 = vshll.u32 %v497_v37, 16  ;;  %v892_v57 = vrot.slane %v890_v46, 4  ;;  %v895_v58 = vrot.slane %v893_v47, 5  ;;  %v539_v61 = vshll.u32 %v499_v38, 16  ;;  %v2018_v63 = vld [vmem:[%s2983_s1 + $0xe] sm:$0x3] }
  0x32   : > { %v1097_v62 = vsel %vm399_vm0, %v1989_v48, 0  ;;  %v2055_v0 = vld [vmem:[%s2983_s1 + $0x10] sm:$0x3]  ;;  %v885_v3 = vshll.u32 %v1961_v50, 16  ;;  %v899_v4 = vshll.u32 %v1963_v51, 16  ;;  %v882_v6 = vor.u32 %v881_v53, %v878_v52  ;;  %s2752_s20 = scalar_lea.vmem [#allocation4], %s1845_s19 }
  0x33   : > { %1106 = vmatpush.bf16.msra.mxu2 %v1097_v62  ;;  %v1413_v5 = vld [vmem:[%s2985_s2] sm:$0x3]  ;;  %v896_v7 = vor.u32 %v895_v58, %v892_v57  ;;  %v1180_v8 = vsel %vm399_vm0, %v2018_v63, 0  ;;  %v1374_v9 = vsel %vm399_vm0, %v2055_v0, 0  ;;  %v1864_v10 = vor.u32 %v2077_v55, %v1863_v49  ;;  %v500_v16 = vld [vmem:[%s2509_s21 + $0x10] sm:$0xf] }
  0x34   : > { %1189 = vmatpush.bf16.msra.mxu3 %v1180_v8  ;;  %1383 = vmatpush.bf16.msra.mxu0 %v1374_v9  ;;  %v1415_v11 = vsel %vm399_vm0, %v1413_v5, 0  ;;  %v523_v12 = vrot.slane %v522_v1, 4  ;;  %v527_v13 = vrot.slane %v525_v56, 5  ;;  %v537_v14 = vrot.slane %v536_v2, 4  ;;  %v502_v21 = vld [vmem:[%s2509_s21 + $0x18] sm:$0xf] }
  0x35   : > { %1424 = vmatpush.bf16.msra.mxu1 %v1415_v11  ;;  %v541_v15 = vrot.slane %v539_v61, 5  ;;  %v883_v17 = vrot.slane %v882_v6, 4  ;;  %v887_v18 = vrot.slane %v885_v3, 5  ;;  %v897_v19 = vrot.slane %v896_v7, 4  ;;  %v1964_v25 = vld [vmem:[%s2509_s21 + $0xa0] sm:$0xf] }
  0x36   : > { %v901_v20 = vrot.slane %v899_v4, 5  ;;  %v544_v23 = vshrl.u32 %v500_v16, 16  ;;  %v547_v24 = vshll.u32 %v500_v16, 16  ;;  %v1966_v26 = vld [vmem:[%s2509_s21 + $0xa8] sm:$0xf]  ;;  %v558_v27 = vshrl.u32 %v502_v21, 16 }
  0x37   : > { %v561_v28 = vshll.u32 %v502_v21, 16  ;;  %v528_v29 = vsel %vm2563_vm4, %v523_v12, %v527_v13  ;;  %v542_v30 = vsel %vm2563_vm4, %v537_v14, %v541_v15  ;;  %v888_v31 = vsel %vm2563_vm4, %v883_v17, %v887_v18  ;;  %v1913_v41 = vld [vmem:[%s2509_s21 + $0x90] sm:$0xf]  ;;  %v501_v42 = vld [vmem:[%s2509_s21 + $0x14] sm:$0x1]  ;;  %s1585_s12 = sshll.u32 %s2752_s20, 4  ;;  %s1586_s12 = int_to_ptr.vmem [resolvable:$true] %s1585_s12 }
  0x38   : > { %v902_v32 = vsel %vm2563_vm4, %v897_v19, %v901_v20  ;;  %v904_v33 = vshrl.u32 %v1964_v25, 16  ;;  %v907_v34 = vshll.u32 %v1964_v25, 16  ;;  %v918_v35 = vshrl.u32 %v1966_v26, 16  ;;  %v2080_v45 = vld [vmem:[%s2509_s21 + $0x94] sm:$0xf0]  ;;  %s2187_s10 = scalar_lea.hbm %s2962_s4, 128 }
  0x39   : > { %v921_v36 = vshll.u32 %v1966_v26, 16  ;;  %v546_v37 = vrot.slane %v544_v23, 4  ;;  %v549_v38 = vrot.slane %v547_v24, 5  ;;  %v629_v39 = vunpack.c.l.b16 %v528_v29  ;;  %v1942_v48 = vld [vmem:[%s2509_s21 + $0xd8] sm:$0xf] }
  0x3a   : > { %v630_v40 = vunpack.c.l.b16 %v542_v30  ;;  %v560_v43 = vrot.slane %v558_v27, 4  ;;  %v563_v44 = vrot.slane %v561_v28, 5  ;;  %v989_v46 = vunpack.c.l.b16 %v888_v31  ;;  %v503_v49 = vld [vmem:[%s2509_s21 + $0x1c] sm:$0x1]  ;;  %v2084_v50 = vld [vmem:[%s2509_s21 + $0xdc] sm:$0xf0] }
  0x3b   : > { %1876 = vmatmul.msk.bf16.gmra.mxu2 %vm386_vm1, %v1872_v54  ;;  %1894 = vmatmul.msk.bf16.gmra.mxu1 %vm386_vm1, %v1884_v59  ;;  %v990_v47 = vunpack.c.l.b16 %v902_v32  ;;  %v906_v51 = vrot.slane %v904_v33, 4  ;;  %v909_v52 = vrot.slane %v907_v34, 5  ;;  %v920_v53 = vrot.slane %v918_v35, 4  ;;  %v1965_v57 = vld [vmem:[%s2509_s21 + $0xa4] sm:$0x1] }
  0x3c   : > { %1896 = vmatmul.msk.bf16.gmra.mxu3 %vm386_vm1, %v1892_v60  ;;  %1874 = vmatmul.msk.bf16.gmra.mxu0 %vm386_vm1, %v1864_v10  ;;  %v923_v54 = vrot.slane %v921_v36, 5  ;;  %v550_v55 = vor.u32 %v549_v38, %v546_v37  ;;  %v553_v56 = vshll.u32 %v501_v42, 16  ;;  %v1967_v58 = vld [vmem:[%s2509_s21 + $0xac] sm:$0x1]  ;;  %v637_v59 = vpack.c.b16 %v630_v40, %v629_v39  ;;  %v504_v9 = vld [vmem:[%s2509_s21 + $0x20] sm:$0xf] }
  0x3d   : > { %v564_v60 = vor.u32 %v563_v44, %v560_v43  ;;  %v567_v61 = vshll.u32 %v503_v49, 16  ;;  %v1914_v62 = vor.u32 %v2080_v45, %v1913_v41  ;;  %v997_v63 = vpack.c.b16 %v990_v47, %v989_v46  ;;  %v506_v10 = vld [vmem:[%s2509_s21 + $0x28] sm:$0xf]  ;;  %v1968_v15 = vld [vmem:[%s2509_s21 + $0xb0] sm:$0xf] }
  0x3e   : > { %v2585_v0 = vor.u32 %v2084_v50, %v1942_v48  ;;  %v910_v1 = vor.u32 %v909_v52, %v906_v51  ;;  %v913_v2 = vshll.u32 %v1965_v57, 16  ;;  %v924_v3 = vor.u32 %v923_v54, %v920_v53  ;;  %v1970_v18 = vld [vmem:[%s2509_s21 + $0xb8] sm:$0xf]  ;;  %v1917_v32 = vld [vmem:[%s2509_s21 + $0xa0] sm:$0xf] }
  0x3f   : > { %v927_v4 = vshll.u32 %v1967_v58, 16  ;;  %v551_v5 = vrot.slane %v550_v55, 4  ;;  %v555_v6 = vrot.slane %v553_v56, 5  ;;  %v565_v7 = vrot.slane %v564_v60, 4  ;;  %v505_v33 = vld [vmem:[%s2509_s21 + $0x24] sm:$0x1] }
  0x40   : > { %v569_v8 = vrot.slane %v567_v61, 5  ;;  %v911_v11 = vrot.slane %v910_v1, 4  ;;  %v915_v12 = vrot.slane %v913_v2, 5  ;;  %v925_v13 = vrot.slane %v924_v3, 4  ;;  %v2081_v38 = vld [vmem:[%s2509_s21 + $0xa4] sm:$0xf0] }
  0x41   : > { %v929_v14 = vrot.slane %v927_v4, 5  ;;  %v556_v16 = vsel %vm2563_vm4, %v551_v5, %v555_v6  ;;  %v572_v17 = vshrl.u32 %v504_v9, 16  ;;  %v575_v20 = vshll.u32 %v504_v9, 16  ;;  %v507_v41 = vld [vmem:[%s2509_s21 + $0x2c] sm:$0x1] }
  0x42   : > { %v570_v19 = vsel %vm2563_vm4, %v565_v7, %v569_v8  ;;  %v586_v21 = vshrl.u32 %v506_v10, 16  ;;  %v589_v23 = vshll.u32 %v506_v10, 16  ;;  %v932_v24 = vshrl.u32 %v1968_v15, 16  ;;  %v1946_v44 = vld [vmem:[%s2509_s21 + $0xe8] sm:$0xf] }
  0x43   : > { %v935_v25 = vshll.u32 %v1968_v15, 16  ;;  %v916_v26 = vsel %vm2563_vm4, %v911_v11, %v915_v12  ;;  %v930_v27 = vsel %vm2563_vm4, %v925_v13, %v929_v14  ;;  %v946_v28 = vshrl.u32 %v1970_v18, 16  ;;  %v1969_v45 = vld [vmem:[%s2509_s21 + $0xb4] sm:$0x1]  ;;  %v2085_v48 = vld [vmem:[%s2509_s21 + $0xec] sm:$0xf0] }
  0x44   : > { %v949_v29 = vshll.u32 %v1970_v18, 16  ;;  %v631_v30 = vunpack.c.l.b16 %v556_v16  ;;  %v632_v31 = vunpack.c.l.b16 %v570_v19  ;;  %v574_v34 = vrot.slane %v572_v17, 4  ;;  %v1971_v50 = vld [vmem:[%s2509_s21 + $0xbc] sm:$0x1]  ;;  %v508_v5 = vld [vmem:[%s2509_s21 + $0x30] sm:$0xf] }
  0x45   : > { %v577_v35 = vrot.slane %v575_v20, 5  ;;  %v588_v36 = vrot.slane %v586_v21, 4  ;;  %v591_v37 = vrot.slane %v589_v23, 5  ;;  %v991_v39 = vunpack.c.l.b16 %v916_v26  ;;  %v510_v8 = vld [vmem:[%s2509_s21 + $0x38] sm:$0xf] }
  0x46   : > { %v992_v40 = vunpack.c.l.b16 %v930_v27  ;;  %v934_v42 = vrot.slane %v932_v24, 4  ;;  %v937_v43 = vrot.slane %v935_v25, 5  ;;  %v948_v46 = vrot.slane %v946_v28, 4  ;;  %v1972_v9 = vld [vmem:[%s2509_s21 + $0xc0] sm:$0xf] }
  0x47   : > { %v951_v47 = vrot.slane %v949_v29, 5  ;;  %v581_v49 = vshll.u32 %v505_v33, 16  ;;  %v638_v51 = vpack.c.b16 %v632_v31, %v631_v30  ;;  %v578_v52 = vor.u32 %v577_v35, %v574_v34  ;;  %v1974_v10 = vld [vmem:[%s2509_s21 + $0xc8] sm:$0xf]  ;;  %v1921_v24 = vld [vmem:[%s2509_s21 + $0xb0] sm:$0xf] }
  0x48   : > { %v592_v53 = vor.u32 %v591_v37, %v588_v36  ;;  %v595_v54 = vshll.u32 %v507_v41, 16  ;;  %v1918_v55 = vor.u32 %v2081_v38, %v1917_v32  ;;  %v998_v56 = vpack.c.b16 %v992_v40, %v991_v39  ;;  %v2082_v25 = vld [vmem:[%s2509_s21 + $0xb4] sm:$0xf0]  ;;  %v2086_v30 = vld [vmem:[%s2509_s21 + $0xfc] sm:$0xf0] }
  0x49   : > { %v938_v57 = vor.u32 %v937_v43, %v934_v42  ;;  %v941_v58 = vshll.u32 %v1969_v45, 16  ;;  %v952_v60 = vor.u32 %v951_v47, %v948_v46  ;;  %v955_v61 = vshll.u32 %v1971_v50, 16  ;;  %v1950_v29 = vld [vmem:[%s2509_s21 + $0xf8] sm:$0xf]  ;;  %v509_v33 = vld [vmem:[%s2509_s21 + $0x34] sm:$0x1] }
  0x4a   : > { %v593_v1 = vrot.slane %v592_v53, 4  ;;  %v597_v2 = vrot.slane %v595_v54, 5  ;;  %v600_v13 = vshrl.u32 %v508_v5, 16  ;;  %v603_v14 = vshll.u32 %v508_v5, 16  ;;  %v511_v37 = vld [vmem:[%s2509_s21 + $0x3c] sm:$0x1] }
  0x4b   : > { %1898 = vmatmul.msk.bf16.vlgmr.msrb.gmra.mxu2 %vm386_vm1, %v637_v59  ;;  %1977 = vmatmul.msk.bf16.vlgmr.msrb.gmra.mxu1 %vm386_vm1, %v997_v63  ;;  %v2612_v59 = vor.u32 %v2085_v48, %v1946_v44  ;;  %v583_v63 = vrot.slane %v581_v49, 5  ;;  %v939_v3 = vrot.slane %v938_v57, 4  ;;  %v943_v4 = vrot.slane %v941_v58, 5  ;;  %v1973_v42 = vld [vmem:[%s2509_s21 + $0xc4] sm:$0x1] }
  0x4c   : > { %1927 = vmatmul.msk.bf16.vlgmr.msrb.gmra.mxu3 %vm386_vm1, %v1914_v62  ;;  %1956 = vmatmul.msk.bf16.vlgmr.msrb.gmra.mxu0 %vm386_vm1, %v2585_v0  ;;  %v579_v62 = vrot.slane %v578_v52, 4  ;;  %v953_v6 = vrot.slane %v952_v60, 4  ;;  %v957_v7 = vrot.slane %v955_v61, 5  ;;  %v598_v12 = vsel %vm2563_vm4, %v593_v1, %v597_v2  ;;  %v1975_v43 = vld [vmem:[%s2509_s21 + $0xcc] sm:$0x1] }
  0x4d   : > { %v944_v15 = vsel %vm2563_vm4, %v939_v3, %v943_v4  ;;  %v614_v16 = vshrl.u32 %v510_v8, 16  ;;  %v617_v17 = vshll.u32 %v510_v8, 16  ;;  %v960_v18 = vshrl.u32 %v1972_v9, 16  ;;  %v2039_v2 = vld [vmem:[%s2509_s21 + $0x8] sm:$0xf] }
  0x4e   : > { %v584_v11 = vsel %vm2563_vm4, %v579_v62, %v583_v63  ;;  %v958_v19 = vsel %vm2563_vm4, %v953_v6, %v957_v7  ;;  %v963_v20 = vshll.u32 %v1972_v9, 16  ;;  %v974_v21 = vshrl.u32 %v1974_v10, 16  ;;  %v2041_v3 = vld [vmem:[%s2509_s21 + $0x10] sm:$0xf] }
  0x4f   : > { %v977_v23 = vshll.u32 %v1974_v10, 16  ;;  %v633_v26 = vunpack.c.l.b16 %v584_v11  ;;  %v634_v27 = vunpack.c.l.b16 %v598_v12  ;;  %v993_v28 = vunpack.c.l.b16 %v944_v15 }
  0x50   : > { %v602_v31 = vrot.slane %v600_v13, 4  ;;  %v994_v32 = vunpack.c.l.b16 %v958_v19  ;;  %v605_v34 = vrot.slane %v603_v14, 5  ;;  %v616_v35 = vrot.slane %v614_v16, 4  ;;  %v1925_v16 = vld [vmem:[%s2509_s21 + $0xc0] sm:$0xf] }
  0x51   : > { %v619_v36 = vrot.slane %v617_v17, 5  ;;  %v962_v38 = vrot.slane %v960_v18, 4  ;;  %v965_v39 = vrot.slane %v963_v20, 5  ;;  %v976_v40 = vrot.slane %v974_v21, 4  ;;  %v2083_v17 = vld [vmem:[%s2509_s21 + $0xc4] sm:$0xf0] }
  0x52   : > { %v979_v41 = vrot.slane %v977_v23, 5  ;;  %v639_v44 = vpack.c.b16 %v634_v27, %v633_v26  ;;  %v1922_v45 = vor.u32 %v2082_v25, %v1921_v24  ;;  %v2639_v46 = vor.u32 %v2086_v30, %v1950_v29  ;;  %v1954_v18 = vld [vmem:[%s2509_s21 + $0x108] sm:$0xf]  ;;  %v2087_v19 = vld [vmem:[%s2509_s21 + $0x10c] sm:$0xf0] }
  0x53   : > { %v609_v47 = vshll.u32 %v509_v33, 16  ;;  %v999_v48 = vpack.c.b16 %v994_v32, %v993_v28  ;;  %v606_v49 = vor.u32 %v605_v34, %v602_v31  ;;  %v620_v50 = vor.u32 %v619_v36, %v616_v35  ;;  %v2040_v26 = vld [vmem:[%s2509_s21 + $0xc] sm:$0x1]  ;;  %v2042_v27 = vld [vmem:[%s2509_s21 + $0x14] sm:$0x1] }
  0x54   : > { %v966_v52 = vor.u32 %v965_v39, %v962_v38  ;;  %v969_v53 = vshll.u32 %v1973_v42, 16  ;;  %v980_v54 = vor.u32 %v979_v41, %v976_v40  ;;  %v1236_v8 = vshrl.u32 %v2039_v2, 16  ;;  %v2043_v35 = vld [vmem:[%s2509_s21 + $0x18] sm:$0xf]  ;;  %v2045_v36 = vld [vmem:[%s2509_s21 + $0x20] sm:$0xf] }
  0x55   : > { %v611_v57 = vrot.slane %v609_v47, 5  ;;  %v621_v58 = vrot.slane %v620_v50, 4  ;;  %v1239_v9 = vshll.u32 %v2039_v2, 16  ;;  %v1250_v10 = vshrl.u32 %v2041_v3, 16  ;;  %v2021_v50 = vld [vmem:[%s2509_s21 + $0x50] sm:$0xf] }
  0x56   : > { %v967_v61 = vrot.slane %v966_v52, 4  ;;  %v971_v62 = vrot.slane %v969_v53, 5  ;;  %v981_v63 = vrot.slane %v980_v54, 4  ;;  %v1253_v11 = vshll.u32 %v2041_v3, 16 }
  0x57   : > { %v1238_v20 = vrot.slane %v1236_v8, 4  ;;  %v1241_v21 = vrot.slane %v1239_v9, 5  ;;  %v1252_v23 = vrot.slane %v1250_v10, 4  ;;  %v1926_v28 = vor.u32 %v2083_v17, %v1925_v16  ;;  %v2047_v9 = vld [vmem:[%s2509_s21 + $0x28] sm:$0xf] }
  0x58   : > { %v972_v6 = vsel %vm2563_vm4, %v967_v61, %v971_v62  ;;  %v1255_v24 = vrot.slane %v1253_v11, 5  ;;  %v2662_v30 = vor.u32 %v2087_v19, %v1954_v18  ;;  %v1245_v32 = vshll.u32 %v2040_v26, 16  ;;  %v2049_v10 = vld [vmem:[%s2509_s21 + $0x30] sm:$0xf]  ;;  %v1996_v16 = vld [vmem:[%s2509_s21 + $0x18] sm:$0xf] }
  0x59   : > { %v995_v14 = vunpack.c.l.b16 %v972_v6  ;;  %v1242_v31 = vor.u32 %v1241_v21, %v1238_v20  ;;  %v1259_v34 = vshll.u32 %v2042_v27, 16  ;;  %v1264_v41 = vshrl.u32 %v2043_v35, 16  ;;  %v2089_v17 = vld [vmem:[%s2509_s21 + $0x1c] sm:$0xf0]  ;;  %v2093_v21 = vld [vmem:[%s2509_s21 + $0x64] sm:$0xf0] }
  0x5a   : > { %v1256_v33 = vor.u32 %v1255_v24, %v1252_v23  ;;  %v1247_v38 = vrot.slane %v1245_v32, 5  ;;  %v1267_v42 = vshll.u32 %v2043_v35, 16  ;;  %v2025_v18 = vld [vmem:[%s2509_s21 + $0x60] sm:$0xf]  ;;  %v2048_v27 = vld [vmem:[%s2509_s21 + $0x2c] sm:$0x1] }
  0x5b   : > { %1899 = vmatmul.msk.bf16.gmra.mxu2 %vm386_vm1, %v638_v51  ;;  %1978 = vmatmul.msk.bf16.gmra.mxu1 %vm386_vm1, %v998_v56  ;;  %v623_v51 = vshll.u32 %v511_v37, 16  ;;  %v607_v56 = vrot.slane %v606_v49, 4  ;;  %v1243_v37 = vrot.slane %v1242_v31, 4  ;;  %v1261_v40 = vrot.slane %v1259_v34, 5  ;;  %v2088_v49 = vld [vmem:[%s2509_s21 + $0xc] sm:$0xf0] }
  0x5c   : > { %1928 = vmatmul.msk.bf16.gmra.mxu3 %vm386_vm1, %v1918_v55  ;;  %1957 = vmatmul.msk.bf16.gmra.mxu0 %vm386_vm1, %v2612_v59  ;;  %v983_v55 = vshll.u32 %v1975_v43, 16  ;;  %v1257_v39 = vrot.slane %v1256_v33, 4  ;;  %v1278_v43 = vshrl.u32 %v2045_v36, 16  ;;  %v1266_v52 = vrot.slane %v1264_v41, 4  ;;  %v2051_v41 = vld [vmem:[%s2509_s21 + $0x38] sm:$0xf] }
  0x5d   : > { %v625_v60 = vrot.slane %v623_v51, 5  ;;  %v612_v4 = vsel %vm2563_vm4, %v607_v56, %v611_v57  ;;  %v2092_v51 = vld [vmem:[%s2509_s21 + $0x54] sm:$0xf0]  ;;  %v1269_v53 = vrot.slane %v1267_v42, 5  ;;  %v2026_v31 = vor.u32 %v2093_v21, %v2025_v18  ;;  %v2053_v42 = vld [vmem:[%s2509_s21 + $0x40] sm:$0xf] }
  0x5e   : > { %v985_v1 = vrot.slane %v983_v55, 5  ;;  %v635_v12 = vunpack.c.l.b16 %v612_v4  ;;  %v1262_v47 = vsel %vm2563_vm4, %v1257_v39, %v1261_v40  ;;  %v1280_v54 = vrot.slane %v1278_v43, 4  ;;  %v2033_v21 = vld [vmem:[%s2509_s21 + $0x80] sm:$0xf] }
  0x5f   : > { %v626_v5 = vsel %vm2563_vm4, %v621_v58, %v625_v60  ;;  %v1350_v57 = vunpack.c.l.b16 %v1262_v47  ;;  %v2044_v58 = vld [vmem:[%s2509_s21 + $0x1c] sm:$0x1]  ;;  %v2046_v60 = vld [vmem:[%s2509_s21 + $0x24] sm:$0x1]  ;;  %v2022_v62 = vor.u32 %v2092_v51, %v2021_v50  ;;  %v1301_v34 = vshll.u32 %v2048_v27, 16 }
  0x60   : > { %v986_v7 = vsel %vm2563_vm4, %v981_v63, %v985_v1  ;;  %v636_v13 = vunpack.c.l.b16 %v626_v5  ;;  %v1270_v63 = vor.u32 %v1269_v53, %v1266_v52  ;;  %v1273_v1 = vshll.u32 %v2044_v58, 16  ;;  %v2090_v50 = vld [vmem:[%s2509_s21 + $0x2c] sm:$0xf0]  ;;  %v2094_v52 = vld [vmem:[%s2509_s21 + $0x74] sm:$0xf0] }
  0x61   : > { %v996_v15 = vunpack.c.l.b16 %v986_v7  ;;  %v1287_v3 = vshll.u32 %v2046_v60, 16  ;;  %v1334_v47 = vshrl.u32 %v2053_v42, 16  ;;  %v2029_v51 = vld [vmem:[%s2509_s21 + $0x70] sm:$0xf] }
  0x62   : > { %v640_v25 = vpack.c.b16 %v636_v13, %v635_v12  ;;  %v1271_v5 = vrot.slane %v1270_v63, 4  ;;  %v1275_v6 = vrot.slane %v1273_v1, 5  ;;  %v1292_v13 = vshrl.u32 %v2047_v9, 16 }
  0x63   : > { %v1000_v29 = vpack.c.b16 %v996_v15, %v995_v14  ;;  %v1289_v8 = vrot.slane %v1287_v3, 5  ;;  %v1306_v14 = vshrl.u32 %v2049_v10, 16  ;;  %v1309_v15 = vshll.u32 %v2049_v10, 16 }
  0x64   : > { %v1276_v11 = vsel %vm2563_vm4, %v1271_v5, %v1275_v6  ;;  %v1294_v23 = vrot.slane %v1292_v13, 4  ;;  %v2030_v63 = vor.u32 %v2094_v52, %v2029_v51 }
  0x65   : > { %v1351_v19 = vunpack.c.l.b16 %v1276_v11  ;;  %v1311_v26 = vrot.slane %v1309_v15, 5 }
  0x6b   : > { %1900 = vmatmul.msk.bf16.gmra.mxu2 %vm386_vm1, %v639_v44  ;;  %1979 = vmatmul.msk.bf16.gmra.mxu1 %vm386_vm1, %v999_v48  ;;  %v1281_v44 = vshll.u32 %v2045_v36, 16  ;;  %v1992_v48 = vld [vmem:[%s2509_s21 + $0x8] sm:$0xf] }
  0x6c   : > { %1929 = vmatmul.msk.bf16.gmra.mxu3 %vm386_vm1, %v1922_v45  ;;  %1958 = vmatmul.msk.bf16.gmra.mxu0 %vm386_vm1, %v2639_v46  ;;  %v1248_v45 = vsel %vm2563_vm4, %v1243_v37, %v1247_v38  ;;  %v1993_v61 = vor.u32 %v2088_v49, %v1992_v48  ;;  %v1303_v38 = vrot.slane %v1301_v34, 5  ;;  %v1337_v48 = vshll.u32 %v2053_v42, 16  ;;  %v2000_v49 = vld [vmem:[%s2509_s21 + $0x28] sm:$0xf] }
  0x6d   : > { %v1283_v55 = vrot.slane %v1281_v44, 5  ;;  %v1349_v56 = vunpack.c.l.b16 %v1248_v45  ;;  %v1320_v45 = vshrl.u32 %v2051_v41, 16  ;;  %v2001_v60 = vor.u32 %v2090_v50, %v2000_v49 }
  0x6e   : > { %v1339_v58 = vrot.slane %v1337_v48, 5 }
  0x6f   : > { %v1284_v2 = vor.u32 %v1283_v55, %v1280_v54  ;;  %v1357_v4 = vpack.c.b16 %v1350_v57, %v1349_v56  ;;  %v1322_v55 = vrot.slane %v1320_v45, 4  ;;  %v1336_v57 = vrot.slane %v1334_v47, 4 }
  0x71   : > { %v1285_v7 = vrot.slane %v1284_v2, 4  ;;  %v1340_v6 = vor.u32 %v1339_v58, %v1336_v57 }
  0x73   : > { %v1290_v12 = vsel %vm2563_vm4, %v1285_v7, %v1289_v8 }
  0x74   : > { %v1352_v20 = vunpack.c.l.b16 %v1290_v12  ;;  %v1341_v12 = vrot.slane %v1340_v6, 4 }
  0x76   : > { %v1358_v32 = vpack.c.b16 %v1352_v20, %v1351_v19  ;;  %v2004_v19 = vld [vmem:[%s2509_s21 + $0x38] sm:$0xf]  ;;  %v2091_v20 = vld [vmem:[%s2509_s21 + $0x3c] sm:$0xf0] }
  0x7b   : > { %1901 = vmatmul.msk.bf16.gmra.mxu2 %vm386_vm1, %v640_v25  ;;  %1980 = vmatmul.msk.bf16.gmra.mxu1 %vm386_vm1, %v1000_v29  ;;  %v1308_v25 = vrot.slane %v1306_v14, 4  ;;  %v1997_v29 = vor.u32 %v2089_v17, %v1996_v16 }
  0x7c   : > { %1930 = vmatmul.msk.bf16.gmra.mxu3 %vm386_vm1, %v1926_v28  ;;  %1959 = vmatmul.msk.bf16.gmra.mxu0 %vm386_vm1, %v2662_v30  ;;  %v2050_v28 = vld [vmem:[%s2509_s21 + $0x34] sm:$0x1] }
  0x7d   : > { %v1312_v35 = vor.u32 %v1311_v26, %v1308_v25  ;;  %v1315_v36 = vshll.u32 %v2050_v28, 16  ;;  %v2005_v28 = vor.u32 %v2091_v20, %v2004_v19 }
  0x7f   : > { %v1313_v39 = vrot.slane %v1312_v35, 4  ;;  %v1317_v40 = vrot.slane %v1315_v36, 5 }
  0x81   : > { %v1318_v44 = vsel %vm2563_vm4, %v1313_v39, %v1317_v40 }
  0x82   : > { %v1354_v54 = vunpack.c.l.b16 %v1318_v44 }
  0x8b   : > { %2006 = vmatmul.msk.bf16.vlgmr.msra.gmra.mxu2 %vm386_vm1, %v1993_v61  ;;  %2060 = vmatmul.msk.bf16.vlgmr.msra.gmra.mxu1 %vm386_vm1, %v2585_v0  ;;  %v1295_v0 = vshll.u32 %v2047_v9, 16  ;;  %v2052_v61 = vld [vmem:[%s2509_s21 + $0x3c] sm:$0x1] }
  0x8c   : > { %2035 = vmatmul.msk.bf16.vlgmr.msra.gmra.mxu3 %vm386_vm1, %v2022_v62  ;;  %2056 = vmatmul.msk.bf16.vlgmr.msra.gmra.mxu0 %vm386_vm1, %v1357_v4  ;;  %v2054_v62 = vld [vmem:[%s2509_s21 + $0x44] sm:$0x1]  ;;  %v1329_v5 = vshll.u32 %v2052_v61, 16 }
  0x8d   : > { %v1297_v24 = vrot.slane %v1295_v0, 5  ;;  %v1343_v7 = vshll.u32 %v2054_v62, 16 }
  0x8e   : > { %v1331_v11 = vrot.slane %v1329_v5, 5 }
  0x8f   : > { %v1298_v33 = vor.u32 %v1297_v24, %v1294_v23  ;;  %v1345_v13 = vrot.slane %v1343_v7, 5  ;;  %v2095_v23 = vld [vmem:[%s2509_s21 + $0x84] sm:$0xf0]  ;;  %s2758_s21 = scalar_lea.vmem [#allocation2], %s1845_s19  ;;  %s2181_s19 = sshra.s32 %s1588_s13, 4  ;;  %s2182_s19 = int_to_ptr.hbm [resolvable:$true] %s2181_s19 }
  0x90   : > { %s2183_s23 = scalar_lea.hbm %s2182_s19, 64  ;;  %p2188_p0 = scmp.lt.s32.totalorder %s2182_s19, %s2962_s4 }
  0x91   : > { %v1299_v37 = vrot.slane %v1298_v33, 4  ;;  %p2184_p11 = scmp.ne.s32.totalorder %s2182_s19, %s2183_s23  ;;  %p2189_p1 = scmp.lt.s32.totalorder %s2187_s10, %s2183_s23 }
  0x93   : > { %v1304_v43 = vsel %vm2563_vm4, %v1299_v37, %v1303_v38  ;;  %p2185_p12 = pnand %p2184_p11, %p2470_p5  ;;  %p2190_p2 = por %p2189_p1, %p2188_p0 }
  0x94   : > { %v1353_v53 = vunpack.c.l.b16 %v1304_v43 }
  0x95   : > { %p2186_p13 = pneg %p2185_p12 }
  0x96   : > { %v1359_v2 = vpack.c.b16 %v1354_v54, %v1353_v53 }
  0x97   : > { %p2191_p3 = pnand %p2190_p2, %p2186_p13 }
  0x9b   : > { %2007 = vmatmul.msk.bf16.gmra.mxu2 %vm386_vm1, %v1997_v29  ;;  %2061 = vmatmul.msk.bf16.gmra.mxu1 %vm386_vm1, %v2612_v59  ;;  %v1323_v59 = vshll.u32 %v2051_v41, 16 }
  0x9c   : > { %2036 = vmatmul.msk.bf16.gmra.mxu3 %vm386_vm1, %v2026_v31  ;;  %2057 = vmatmul.msk.bf16.gmra.mxu0 %vm386_vm1, %v1358_v32  ;;  %v2034_v31 = vor.u32 %v2095_v23, %v2033_v21 }
  0x9d   : > { %v1325_v56 = vrot.slane %v1323_v59, 5 }
  0x9f   : > { %v1326_v4 = vor.u32 %v1325_v56, %v1322_v55 }
  0xa1   : > { %v1327_v10 = vrot.slane %v1326_v4, 4 }
  0xa3   : > { %v1332_v17 = vsel %vm2563_vm4, %v1327_v10, %v1331_v11 }
  0xa4   : > { %v1355_v24 = vunpack.c.l.b16 %v1332_v17 }
  0xa8   : > { %v476_v1 = vpop.f32.mrf.mxu1 }
  0xa9   : > { %v412_v3 = vpop.f32.mrf.mxu0 }
  0xaa   : > { %v477_v8 = vadd.f32 %v476_v1, %v412_v3 }
  0xab   : > { %2008 = vmatmul.msk.bf16.gmra.mxu2 %vm386_vm1, %v2001_v60  ;;  %2062 = vmatmul.msk.bf16.gmra.mxu1 %vm386_vm1, %v2639_v46  ;;  %v1346_v46 = vsel %vm2563_vm4, %v1341_v12, %v1345_v13 }
  0xac   : > { %2037 = vmatmul.msk.bf16.gmra.mxu3 %vm386_vm1, %v2030_v63  ;;  %2058 = vmatmul.msk.bf16.gmra.mxu0 %vm386_vm1, %v1359_v2  ;;  %v1356_v25 = vunpack.c.l.b16 %v1346_v46 }
  0xae   : > { %v422_v9 = vpop.f32.mrf.mxu2  ;;  %v1360_v33 = vpack.c.b16 %v1356_v25, %v1355_v24 }
  0xaf   : > { %v486_v0 = vpop.f32.mrf.mxu3 }
  0xb0   : > { %v2720_v14 = vadd.f32 %v486_v0, %v422_v9  ;;  %v478_v15 = vpop.f32.mrf.mxu1 }
  0xb1   : > { %v414_v16 = vpop.f32.mrf.mxu0 }
  0xb2   : > { %v479_v18 = vadd.f32 %v478_v15, %v414_v16 }
  0xb6   : > { %v424_v26 = vpop.f32.mrf.mxu2 }
  0xb7   : > { %v488_v27 = vpop.f32.mrf.mxu3 }
  0xb8   : > { %v489_v29 = vadd.f32 %v488_v27, %v424_v26  ;;  %v481_v32 = vpop.f32.mrf.mxu1 }
  0xb9   : > { %v417_v34 = vpop.f32.mrf.mxu0 }
  0xba   : > { %v482_v35 = vadd.f32 %v481_v32, %v417_v34 }
  0xbb   : > { %2009 = vmatmul.msk.bf16.gmra.mxu2 %vm386_vm1, %v2005_v28  ;;  %2063 = vmatmul.msk.bf16.gmra.mxu1 %vm386_vm1, %v2662_v30 }
  0xbc   : > { %2038 = vmatmul.msk.bf16.gmra.mxu3 %vm386_vm1, %v2034_v31  ;;  %2059 = vmatmul.msk.bf16.gmra.mxu0 %vm386_vm1, %v1360_v33 }
  0xbe   : > { %v427_v22 = vpop.f32.mrf.mxu2 }
  0xbf   : > { %v491_v36 = vpop.f32.mrf.mxu3 }
  0xc0   : > { %v492_v37 = vadd.f32 %v491_v36, %v427_v22  ;;  %v483_v38 = vpop.f32.mrf.mxu1 }
  0xc1   : > { %v419_v39 = vpop.f32.mrf.mxu0 }
  0xc2   : > { %v484_v40 = vadd.f32 %v483_v38, %v419_v39 }
  0xc6   : > { %v429_v41 = vpop.f32.mrf.mxu2 }
  0xc7   : > { %v493_v42 = vpop.f32.mrf.mxu3 }
  0xc8   : > { %v494_v43 = vadd.f32 %v493_v42, %v429_v41  ;;  %v1025_v44 = vpop.f32.mrf.mxu1 }
  0xc9   : > { %v831_v45 = vpop.f32.mrf.mxu0 }
  0xce   : > { %v665_v59 = vpop.f32.mrf.mxu2 }
  0xcf   : > { %v685_v47 = vadd.f32 %v665_v59, %v477_v8  ;;  %v748_v48 = vpop.f32.mrf.mxu3 }
  0xd0   : > { %v1027_v50 = vpop.f32.mrf.mxu1 }
  0xd1   : > { %v768_v49 = vadd.f32 %v748_v48, %v685_v47  ;;  %v833_v51 = vpop.f32.mrf.mxu0 }
  0xd3   : > { %v851_v30 = vadd.f32 %v831_v45, %v768_v49 }
  0xd5   : > { %v1045_v52 = vadd.f32 %v1025_v44, %v851_v30 }
  0xd6   : > { %v667_v53 = vpop.f32.mrf.mxu2 }
  0xd7   : > { %v686_v54 = vadd.f32 %v667_v53, %v479_v18  ;;  %v750_v55 = vpop.f32.mrf.mxu3 }
  0xd8   : > { %v1030_v57 = vpop.f32.mrf.mxu1 }
  0xd9   : > { %v769_v56 = vadd.f32 %v750_v55, %v686_v54  ;;  %v836_v58 = vpop.f32.mrf.mxu0 }
  0xdb   : > { %v852_v60 = vadd.f32 %v833_v51, %v769_v56 }
  0xdd   : > { %v2735_v61 = vadd.f32 %v1027_v50, %v852_v60 }
  0xde   : > { %v670_v62 = vpop.f32.mrf.mxu2 }
  0xdf   : > { %v687_v63 = vadd.f32 %v670_v62, %v482_v35  ;;  %v753_v1 = vpop.f32.mrf.mxu3 }
  0xe0   : > { %v1032_v3 = vpop.f32.mrf.mxu1 }
  0xe1   : > { %v770_v2 = vadd.f32 %v753_v1, %v687_v63  ;;  %v838_v4 = vpop.f32.mrf.mxu0 }
  0xe3   : > { %v853_v5 = vadd.f32 %v836_v58, %v770_v2 }
  0xe5   : > { %v2737_v6 = vadd.f32 %v1030_v57, %v853_v5 }
  0xe6   : > { %v672_v7 = vpop.f32.mrf.mxu2 }
  0xe7   : > { %v688_v8 = vadd.f32 %v672_v7, %v484_v40  ;;  %v755_v9 = vpop.f32.mrf.mxu3 }
  0xe8   : > { %v1035_v11 = vpop.f32.mrf.mxu1 }
  0xe9   : > { %v771_v10 = vadd.f32 %v755_v9, %v688_v8  ;;  %v841_v12 = vpop.f32.mrf.mxu0 }
  0xeb   : > { %v854_v13 = vadd.f32 %v838_v4, %v771_v10 }
  0xed   : > { %v2739_v0 = vadd.f32 %v1032_v3, %v854_v13 }
  0xee   : > { %v675_v15 = vpop.f32.mrf.mxu2 }
  0xef   : > { %v689_v16 = vadd.f32 %v675_v15, %v2720_v14  ;;  %v758_v17 = vpop.f32.mrf.mxu3 }
  0xf0   : > { %v1037_v18 = vpop.f32.mrf.mxu1 }
  0xf1   : > { %v772_v46 = vadd.f32 %v758_v17, %v689_v16  ;;  %v843_v19 = vpop.f32.mrf.mxu0 }
  0xf3   : > { %v855_v20 = vadd.f32 %v841_v12, %v772_v46 }
  0xf5   : > { %v2742_v21 = vadd.f32 %v1035_v11, %v855_v20 }
  0xf6   : > { %v677_v23 = vpop.f32.mrf.mxu2 }
  0xf7   : > { %v690_v24 = vadd.f32 %v677_v23, %v489_v29  ;;  %v760_v25 = vpop.f32.mrf.mxu3 }
  0xf8   : > { %v1040_v27 = vpop.f32.mrf.mxu1 }
  0xf9   : > { %v773_v26 = vadd.f32 %v760_v25, %v690_v24  ;;  %v846_v28 = vpop.f32.mrf.mxu0 }
  0xfb   : > { %v856_v31 = vadd.f32 %v843_v19, %v773_v26 }
  0xfd   : > { %v2744_v32 = vadd.f32 %v1037_v18, %v856_v31 }
  0xfe   : > { %v680_v33 = vpop.f32.mrf.mxu2 }
  0xff   : > { %v691_v34 = vadd.f32 %v680_v33, %v492_v37  ;;  %v763_v14 = vpop.f32.mrf.mxu3 }
 0x100   : > { %v1042_v22 = vpop.f32.mrf.mxu1 }
 0x101   : > { %v774_v35 = vadd.f32 %v763_v14, %v691_v34  ;;  %v848_v36 = vpop.f32.mrf.mxu0 }
 0x103   : > { %v857_v38 = vadd.f32 %v846_v28, %v774_v35 }
 0x105   : > { %v2750_v39 = vadd.f32 %v1040_v27, %v857_v38 }
 0x106   : > { %v682_v29 = vpop.f32.mrf.mxu2 }
 0x107   : > { %v692_v40 = vadd.f32 %v682_v29, %v494_v43  ;;  %v765_v41 = vpop.f32.mrf.mxu3 }
 0x108   : > { %v1426_v44 = vpop.f32.mrf.mxu1 }
 0x109   : > { %v775_v42 = vadd.f32 %v765_v41, %v692_v40  ;;  %1454 = vst [vmem:[%s2752_s20] sm:$0xff] %v1426_v44  ;;  %v1385_v37 = vpop.f32.mrf.mxu0 }
 0x10b   : > { %v858_v45 = vadd.f32 %v848_v36, %v775_v42 }
 0x10d   : > { %v2755_v59 = vadd.f32 %v1042_v22, %v858_v45 }
 0x10e   : > { %v1108_v47 = vpop.f32.mrf.mxu2 }
 0x10f   : > { %v1128_v48 = vadd.f32 %v1108_v47, %v1045_v52  ;;  %v1191_v49 = vpop.f32.mrf.mxu3 }
 0x110   : > { %v1428_v51 = vpop.f32.mrf.mxu1 }
 0x111   : > { %v1211_v50 = vadd.f32 %v1191_v49, %v1128_v48  ;;  %1455 = vst [vmem:[%s2752_s20 + $0x8] sm:$0xff] %v1428_v51  ;;  %v1387_v43 = vpop.f32.mrf.mxu0  ;;  %v1513_v28 = vmul.f32 %v1428_v51, %v1428_v51  ;;  %v1498_v33 = vadd.f32 %v1428_v51, %v1426_v44 }
 0x113   : > { %v1405_v30 = vadd.f32 %v1385_v37, %v1211_v50 }
 0x115   : > { %1446 = vst [vmem:[%s2758_s21] sm:$0xff] %v1405_v30  ;;  %v1476_v60 = vmul.f32 %v1405_v30, %v1405_v30 }
 0x116   : > { %v1110_v53 = vpop.f32.mrf.mxu2 }
 0x117   : > { %v1129_v54 = vadd.f32 %v1110_v53, %v2735_v61  ;;  %v1193_v55 = vpop.f32.mrf.mxu3 }
 0x118   : > { %v1431_v57 = vpop.f32.mrf.mxu1 }
 0x119   : > { %v1212_v56 = vadd.f32 %v1193_v55, %v1129_v54  ;;  %1456 = vst [vmem:[%s2752_s20 + $0x10] sm:$0xff] %v1431_v57  ;;  %v1390_v52 = vpop.f32.mrf.mxu0  ;;  %v1514_v22 = vmul.f32 %v1431_v57, %v1431_v57  ;;  %v1499_v41 = vadd.f32 %v1498_v33, %v1431_v57 }
 0x11b   : > { %v1406_v58 = vadd.f32 %v1387_v43, %v1212_v56 }
 0x11d   : > { %1447 = vst [vmem:[%s2758_s21 + $0x8] sm:$0xff] %v1406_v58  ;;  %v1462_v62 = vadd.f32 %v1406_v58, %v1405_v30  ;;  %v1477_v63 = vmul.f32 %v1406_v58, %v1406_v58 }
 0x11e   : > { %v1113_v1 = vpop.f32.mrf.mxu2 }
 0x11f   : > { %v1484_v2 = vadd.f32 %v1477_v63, %v1476_v60  ;;  %v1130_v3 = vadd.f32 %v1113_v1, %v2737_v6  ;;  %v1196_v4 = vpop.f32.mrf.mxu3 }
 0x120   : > { %v1433_v61 = vpop.f32.mrf.mxu1 }
 0x121   : > { %v1213_v5 = vadd.f32 %v1196_v4, %v1130_v3  ;;  %1457 = vst [vmem:[%s2752_s20 + $0x18] sm:$0xff] %v1433_v61  ;;  %v1392_v7 = vpop.f32.mrf.mxu0  ;;  %v1515_v42 = vmul.f32 %v1433_v61, %v1433_v61  ;;  %v1500_v47 = vadd.f32 %v1499_v41, %v1433_v61 }
 0x123   : > { %v1407_v8 = vadd.f32 %v1390_v52, %v1213_v5 }
 0x125   : > { %1448 = vst [vmem:[%s2758_s21 + $0x10] sm:$0xff] %v1407_v8  ;;  %v1463_v9 = vadd.f32 %v1462_v62, %v1407_v8  ;;  %v1478_v10 = vmul.f32 %v1407_v8, %v1407_v8 }
 0x126   : > { %v1115_v11 = vpop.f32.mrf.mxu2 }
 0x127   : > { %v1485_v12 = vadd.f32 %v1484_v2, %v1478_v10  ;;  %v1131_v13 = vadd.f32 %v1115_v11, %v2739_v0  ;;  %v1198_v15 = vpop.f32.mrf.mxu3  ;;  %v1512_v0 = vmul.f32 %v1426_v44, %v1426_v44 }
 0x128   : > { %v1436_v17 = vpop.f32.mrf.mxu1 }
 0x129   : > { %v1214_v16 = vadd.f32 %v1198_v15, %v1131_v13  ;;  %1458 = vst [vmem:[%s2752_s20 + $0x20] sm:$0xff] %v1436_v17  ;;  %v1395_v46 = vpop.f32.mrf.mxu0  ;;  %v1520_v35 = vadd.f32 %v1513_v28, %v1512_v0  ;;  %v1516_v48 = vmul.f32 %v1436_v17, %v1436_v17  ;;  %v1501_v50 = vadd.f32 %v1500_v47, %v1436_v17 }
 0x12b   : > { %v1408_v6 = vadd.f32 %v1392_v7, %v1214_v16  ;;  %v1521_v45 = vadd.f32 %v1520_v35, %v1514_v22 }
 0x12d   : > { %1449 = vst [vmem:[%s2758_s21 + $0x18] sm:$0xff] %v1408_v6  ;;  %v1464_v18 = vadd.f32 %v1463_v9, %v1408_v6  ;;  %v1479_v19 = vmul.f32 %v1408_v6, %v1408_v6 }
 0x12e   : > { %v1118_v20 = vpop.f32.mrf.mxu2 }
 0x12f   : > { %v1486_v23 = vadd.f32 %v1485_v12, %v1479_v19  ;;  %v1132_v24 = vadd.f32 %v1118_v20, %v2742_v21  ;;  %v1201_v25 = vpop.f32.mrf.mxu3 }
 0x130   : > { %v1438_v27 = vpop.f32.mrf.mxu1 }
 0x131   : > { %v1215_v26 = vadd.f32 %v1201_v25, %v1132_v24  ;;  %1459 = vst [vmem:[%s2752_s20 + $0x28] sm:$0xff] %v1438_v27  ;;  %v1397_v36 = vpop.f32.mrf.mxu0  ;;  %v1517_v51 = vmul.f32 %v1438_v27, %v1438_v27  ;;  %v1502_v54 = vadd.f32 %v1501_v50, %v1438_v27 }
 0x133   : > { %v1409_v31 = vadd.f32 %v1395_v46, %v1215_v26 }
 0x135   : > { %1450 = vst [vmem:[%s2758_s21 + $0x20] sm:$0xff] %v1409_v31  ;;  %v1465_v34 = vadd.f32 %v1464_v18, %v1409_v31  ;;  %v1480_v14 = vmul.f32 %v1409_v31, %v1409_v31 }
 0x136   : > { %v1120_v38 = vpop.f32.mrf.mxu2 }
 0x137   : > { %v1487_v21 = vadd.f32 %v1486_v23, %v1480_v14  ;;  %v1133_v29 = vadd.f32 %v1120_v38, %v2744_v32  ;;  %v1203_v40 = vpop.f32.mrf.mxu3  ;;  %v1522_v32 = vadd.f32 %v1521_v45, %v1515_v42 }
 0x138   : > { %v1441_v37 = vpop.f32.mrf.mxu1 }
 0x139   : > { %v1216_v44 = vadd.f32 %v1203_v40, %v1133_v29  ;;  %1460 = vst [vmem:[%s2752_s20 + $0x30] sm:$0xff] %v1441_v37  ;;  %v1523_v53 = vadd.f32 %v1522_v32, %v1516_v48  ;;  %v1518_v55 = vmul.f32 %v1441_v37, %v1441_v37  ;;  %v1503_v62 = vadd.f32 %v1502_v54, %v1441_v37  ;;  %v1400_v63 = vpop.f32.mrf.mxu0 }
 0x13b   : > { %v1410_v49 = vadd.f32 %v1397_v36, %v1216_v44  ;;  %v1524_v60 = vadd.f32 %v1523_v53, %v1517_v51 }
 0x13d   : > { %1451 = vst [vmem:[%s2758_s21 + $0x28] sm:$0xff] %v1410_v49  ;;  %v1466_v43 = vadd.f32 %v1465_v34, %v1410_v49  ;;  %v1481_v30 = vmul.f32 %v1410_v49, %v1410_v49  ;;  %v1525_v3 = vadd.f32 %v1524_v60, %v1518_v55 }
 0x13e   : > { %v1123_v56 = vpop.f32.mrf.mxu2 }
 0x13f   : > { %v1488_v57 = vadd.f32 %v1487_v21, %v1481_v30  ;;  %v1134_v52 = vadd.f32 %v1123_v56, %v2750_v39  ;;  %v1206_v58 = vpop.f32.mrf.mxu3 }
 0x140   : > { %v1443_v2 = vpop.f32.mrf.mxu1 }
 0x141   : > { %v1217_v1 = vadd.f32 %v1206_v58, %v1134_v52  ;;  %1461 = vst [vmem:[%s2752_s20 + $0x38] sm:$0xff] %v1443_v2  ;;  %v1504_v4 = vadd.f32 %v1503_v62, %v1443_v2  ;;  %v1519_v5 = vmul.f32 %v1443_v2, %v1443_v2 }
 0x143   : > { %v1411_v61 = vadd.f32 %v1400_v63, %v1217_v1 }
 0x144   : > { %2194 = shalt.err (!%p2191_p3)
}
 0x145   : > { %s2970_s20 = smov 128   ;;  %s2971_s26 = smov 8   ;;  %v1505_v39 = vrot.slane %v1504_v4, 4  ;;  %v1526_v7 = vadd.f32 %v1525_v3, %v1519_v5  ;;  %1452 = vst [vmem:[%s2758_s21 + $0x30] sm:$0xff] %v1411_v61  ;;  %v1467_v8 = vadd.f32 %v1466_v43, %v1411_v61  ;;  %v1482_v9 = vmul.f32 %v1411_v61, %v1411_v61  ;;  %v1402_v20 = vpop.f32.mrf.mxu0 }
 0x146   : > { %2102 = dma.vmem_to_hbm [thread:$0]  (%p2470_p5), %s1586_s12, 1024, %s1588_s13, %s2788_s17, %s2970_s20, %s2970_s20, %s2971_s26   ;;  %v1125_v12 = vpop.f32.mrf.mxu2 }
 0x147   : > { %s2988_s0 = sshll.u32 %s2451_s9, 6  ;;  %v1506_v10 = vadd.f32 %v1505_v39, %v1504_v4  ;;  %v1527_v11 = vrot.slane %v1526_v7, 4  ;;  %v1489_v13 = vadd.f32 %v1488_v57, %v1482_v9  ;;  %v1135_v15 = vadd.f32 %v1125_v12, %v2755_v59  ;;  %v1208_v6 = vpop.f32.mrf.mxu3  ;;  %s1568_s12 = sshll.u32 %s2758_s21, 4  ;;  %s1569_s12 = int_to_ptr.vmem [resolvable:$true] %s1568_s12 }
 0x148   : > { %s1567_s19 = scalar_lea.hbm %s2961_s3, %s2988_s0  ;;  %s1638_s25 = scalar_lea.hbm %s2966_s8, %s2451_s9 }
 0x149   : > { %v1507_v16 = vrot.slane %v1506_v10, 2  ;;  %v1528_v17 = vadd.f32 %v1527_v11, %v1526_v7  ;;  %s1570_s13 = sshll.u32 %s1567_s19, 4  ;;  %v1218_v46 = vadd.f32 %v1208_v6, %v1135_v15  ;;  %s2972_s0 = scalar_lea.vmem [#allocation10], %s2747_s18  ;;  %s1571_s13 = int_to_ptr.hbm [resolvable:$true] %s1570_s13 }
 0x14a   : > { %s2820_s10 = sshll.u32 %s2972_s0, 4  ;;  %s2822_s22 = sshll.u32 %s1638_s25, 4  ;;  %s1641_s10 = int_to_ptr.vmem [resolvable:$true] %s2820_s10  ;;  %s1643_s22 = int_to_ptr.hbm [resolvable:$true] %s2822_s22 }
 0x14b   : > { %v1508_v18 = vadd.f32 %v1507_v16, %v1506_v10  ;;  %v1529_v19 = vrot.slane %v1528_v17, 2  ;;  %v1412_v23 = vadd.f32 %v1402_v20, %v1218_v46  ;;  %s1535_s19 = scalar_lea.sflag [#allocation3], %s2747_s18  ;;  %s2209_s20 = sshra.s32 %s1571_s13, 4  ;;  %s2210_s20 = int_to_ptr.hbm [resolvable:$true] %s2209_s20 }
 0x14c   : > { %s2211_s23 = scalar_lea.hbm %s2210_s20, 64  ;;  %p2216_p9 = scmp.lt.s32.totalorder %s2210_s20, %s2961_s3 }
 0x14d   : > { %v1509_v59 = vrot.slane %v1508_v18, 1  ;;  %v1530_v24 = vadd.f32 %v1529_v19, %v1528_v17  ;;  %1453 = vst [vmem:[%s2758_s21 + $0x38] sm:$0xff] %v1412_v23  ;;  %v1468_v25 = vadd.f32 %v1467_v8, %v1412_v23  ;;  %v1483_v26 = vmul.f32 %v1412_v23, %v1412_v23  ;;  %p2212_p4 = scmp.ne.s32.totalorder %s2210_s20, %s2211_s23  ;;  %s2215_s21 = scalar_lea.hbm %s2961_s3, 128 }
 0x14e   : > { %p2217_p10 = scmp.lt.s32.totalorder %s2215_s21, %s2211_s23 }
 0x14f   : > { %p2213_p7 = pnand %p2212_p4, %p2470_p5 }
 0x150   : > { %p2218_p11 = por %p2217_p10, %p2216_p9 }
 0x151   : > { %p2214_p8 = pneg %p2213_p7 }
 0x153   : > { %p2219_p12 = pnand %p2218_p11, %p2214_p8 }
 0x155   : > { %2222 = shalt.err (!%p2219_p12)
}
 0x156   : > { %s2989_s25 = smov 8   ;;  %s2990_s0 = smov 128   ;;  %v1510_v27 = vadd.f32 %v1509_v59, %v1508_v18  ;;  %v1531_v0 = vrot.slane %v1530_v24, 1  ;;  %v1469_v28 = vrot.slane %v1468_v25, 4  ;;  %v1490_v31 = vadd.f32 %v1489_v13, %v1483_v26 }
 0x157   : > { %2101 = dma.vmem_to_hbm [thread:$0]  (%p2470_p5), %s1569_s12, 1024, %s1571_s13, %s1535_s19, %s2990_s0, %s2990_s0, %s2989_s25  }
 0x158   : > { %s2973_s1 = scalar_lea.vmem [#allocation9], %s2747_s18  ;;  %v1532_v33 = vadd.f32 %v1531_v0, %v1530_v24  ;;  %v1470_v34 = vadd.f32 %v1469_v28, %v1468_v25  ;;  %v1491_v14 = vrot.slane %v1490_v31, 4  ;;  %s1599_s20 = scalar_lea.hbm %s2963_s5, %s2451_s9 }
 0x159   : > { %1511 = vst [vmem:[%s2973_s1] sm:$0x1] %v1510_v27  ;;  %s2991_s23 = scalar_lea.vmem [#allocation10], %s2747_s18  ;;  %s1557_s12 = scalar_lea.sflag [#allocation11], %s2747_s18 }
 0x15a   : > { %1533 = vst [vmem:[%s2991_s23] sm:$0x1] %v1532_v33  ;;  %v1471_v35 = vrot.slane %v1470_v34, 2  ;;  %v1492_v22 = vadd.f32 %v1491_v14, %v1490_v31  ;;  %s2237_s13 = sshra.s32 %s1643_s22, 4  ;;  %s2243_s21 = scalar_lea.hbm %s2966_s8, 2  ;;  %s2238_s13 = int_to_ptr.hbm [resolvable:$true] %s2237_s13 }
 0x15b   : > { %s2239_s0 = scalar_lea.hbm %s2238_s13, 1  ;;  %p2244_p2 = scmp.lt.s32.totalorder %s2238_s13, %s2966_s8 }
 0x15c   : > { %p2240_p13 = scmp.ne.s32.totalorder %s2238_s13, %s2239_s0  ;;  %p2245_p3 = scmp.lt.s32.totalorder %s2243_s21, %s2239_s0 }
 0x15e   : > { %p2241_p0 = pnand %p2240_p13, %p2470_p5  ;;  %p2246_p4 = por %p2245_p3, %p2244_p2 }
 0x160   : > { %p2242_p1 = pneg %p2241_p0 }
 0x162   : > { %p2247_p7 = pnand %p2246_p4, %p2242_p1 }
 0x164   : > { %2250 = shalt.err (!%p2247_p7)
}
 0x165   : > { %2106 = dma.vmem_to_hbm [thread:$0]  (%p2470_p5), %s1641_s10, 16, %s1643_s22, %s1557_s12   ;;  %v1493_v36 = vrot.slane %v1492_v22, 2  ;;  %v1472_v38 = vadd.f32 %v1471_v35, %v1470_v34 }
 0x166   : > { %s1612_s23 = scalar_lea.hbm %s2964_s6, %s2451_s9  ;;  %s1625_s0 = scalar_lea.hbm %s2965_s7, %s2451_s9 }
 0x167   : > { %s321_s19 = scalar_lea.vmem [#allocation6], %s2747_s18  ;;  %s2871_s21 = sshll.u32 %s1599_s20, 4  ;;  %v1494_v21 = vadd.f32 %v1493_v36, %v1492_v22  ;;  %v1473_v29 = vrot.slane %v1472_v38, 1  ;;  %s1604_s21 = int_to_ptr.hbm [resolvable:$true] %s2871_s21 }
 0x168   : > { %s2869_s24 = sshll.u32 %s321_s19, 4  ;;  %s2974_s25 = scalar_lea.vmem [#allocation7], %s2747_s18  ;;  %s1602_s24 = int_to_ptr.vmem [resolvable:$true] %s2869_s24 }
 0x169   : > { %s2876_s10 = sshll.u32 %s2974_s25, 4  ;;  %s2878_s22 = sshll.u32 %s1612_s23, 4  ;;  %v1495_v40 = vrot.slane %v1494_v21, 1  ;;  %v1474_v41 = vadd.f32 %v1473_v29, %v1472_v38  ;;  %s1615_s10 = int_to_ptr.vmem [resolvable:$true] %s2876_s10  ;;  %s1617_s22 = int_to_ptr.hbm [resolvable:$true] %s2878_s22 }
 0x16a   : > { %s2992_s12 = scalar_lea.vmem [#allocation9], %s2747_s18  ;;  %s2884_s26 = sshll.u32 %s1625_s0, 4 }
 0x16b   : > { %s2882_s2 = sshll.u32 %s2992_s12, 4  ;;  %2994 = sst [smem:[#allocation17_spill]] %s2884_s26  ;;  %v1496_v42 = vadd.f32 %v1495_v40, %v1494_v21  ;;  %1475 = vst [vmem:[%s321_s19] sm:$0x1] %v1474_v41 }
 0x16c   : > { %2993 = sst [smem:[#allocation16_spill]] %s2882_s2  ;;  %s2265_s20 = sshra.s32 %s1604_s21, 4  ;;  %s2266_s20 = int_to_ptr.hbm [resolvable:$true] %s2265_s20 }
 0x16d   : > { %s2267_s23 = scalar_lea.hbm %s2266_s20, 1  ;;  %s2271_s0 = scalar_lea.hbm %s2963_s5, 2 }
 0x16e   : > { %p2268_p8 = scmp.ne.s32.totalorder %s2266_s20, %s2267_s23  ;;  %p2272_p11 = scmp.lt.s32.totalorder %s2266_s20, %s2963_s5 }
 0x16f   : > { %p2273_p12 = scmp.lt.s32.totalorder %s2271_s0, %s2267_s23 }
 0x170   : > { %p2269_p9 = pnand %p2268_p8, %p2470_p5 }
 0x171   : > { %p2274_p13 = por %p2273_p12, %p2272_p11 }
 0x172   : > { %p2270_p10 = pneg %p2269_p9 }
 0x174   : > { %p2275_p0 = pnand %p2274_p13, %p2270_p10 }
 0x176   : > { %2278 = shalt.err (!%p2275_p0)
}
 0x177   : > { %2103 = dma.vmem_to_hbm [thread:$0]  (%p2470_p5), %s1602_s24, 16, %s1604_s21, %s2788_s17  }
 0x178   : > { %s2995_s19 = scalar_lea.vmem [#allocation7], %s2747_s18  ;;  %s2996_s1 = sand.u32 1, %s2451_s9  }
 0x179   : > { %1497 = vst [vmem:[%s2995_s19] sm:$0x1] %v1496_v42  ;;  %s1549_s13 = scalar_lea.sflag [#allocation8], %s2996_s1  ;;  %s2293_s2 = sshra.s32 %s1617_s22, 4  ;;  %s2294_s2 = int_to_ptr.hbm [resolvable:$true] %s2293_s2 }
 0x17a   : > { %s2295_s25 = scalar_lea.hbm %s2294_s2, 1  ;;  %s2299_s0 = scalar_lea.hbm %s2964_s6, 2 }
 0x17b   : > { %p2296_p1 = scmp.ne.s32.totalorder %s2294_s2, %s2295_s25  ;;  %p2300_p4 = scmp.lt.s32.totalorder %s2294_s2, %s2964_s6 }
 0x17c   : > { %p2301_p7 = scmp.lt.s32.totalorder %s2299_s0, %s2295_s25 }
 0x17d   : > { %p2297_p2 = pnand %p2296_p1, %p2470_p5 }
 0x17e   : > { %p2302_p8 = por %p2301_p7, %p2300_p4 }
 0x17f   : > { %p2298_p3 = pneg %p2297_p2 }
 0x181   : > { %p2303_p9 = pnand %p2302_p8, %p2298_p3 }
 0x183   : > { %2306 = shalt.err (!%p2303_p9)
}
 0x184   : > { %s2997_s9 = sld [smem:[#allocation17_spill]]  ;;  %s2327_s26 = scalar_lea.hbm %s2965_s7, 2 }
 0x185   : > { %2104 = dma.vmem_to_hbm [thread:$0]  (%p2470_p5), %s1615_s10, 16, %s1617_s22, %s1549_s13  }
 0x18a   : > { %s2998_s18 = int_to_ptr.hbm [resolvable:$true] %s2997_s9 }
 0x18b   : > { %s2321_s17 = sshra.s32 %s2998_s18, 4  ;;  %s2322_s17 = int_to_ptr.hbm [resolvable:$true] %s2321_s17 }
 0x18c   : > { %s2323_s24 = scalar_lea.hbm %s2322_s17, 1  ;;  %p2328_p13 = scmp.lt.s32.totalorder %s2322_s17, %s2965_s7 }
 0x18d   : > { %p2324_p10 = scmp.ne.s32.totalorder %s2322_s17, %s2323_s24  ;;  %p2329_p0 = scmp.lt.s32.totalorder %s2327_s26, %s2323_s24 }
 0x18f   : > { %p2325_p11 = pnand %p2324_p10, %p2470_p5  ;;  %p2330_p1 = por %p2329_p0, %p2328_p13 }
 0x191   : > { %p2326_p12 = pneg %p2325_p11 }
 0x193   : > { %p2331_p2 = pnand %p2330_p1, %p2326_p12 }
 0x195   : > { %2334 = shalt.err (!%p2331_p2)
}
 0x196   : > { %s2999_s10 = smov %s2998_s18  ;;  %s3000_s22 = sld [smem:[#allocation16_spill]] }
 0x19c   : > { %s3001_s25 = int_to_ptr.vmem [resolvable:$true] %s3000_s22 }
 0x19d   : > { %2105 = dma.vmem_to_hbm [thread:$0]  (%p2470_p5), %s3001_s25, 16, %s2999_s10, %s1549_s13  }
 0x19e PF: > { %p2132_p3 = scmp.ge.s32.totalorder %s2381_s30, 2  ;;  %s1654_s20 = sand.u32 1, %s2369_s27  }
 0x19f   : > { %s1655_s23 = scalar_lea.sflag [#allocation3], %s1654_s20 }
 0x1a0   : > { %p2114_p4 = pnand %p2132_p3, %p2474_p6 }
 0x1a2   : > { %p2115_p7 = pneg %p2114_p4 }
 0x1a4   : > { %2352 = dma.done.wait (%p2115_p7), %s1655_s23, 1024  }
 0x1a5   : > { %2354 = vsyncadd (%p2115_p7), %s1655_s23, 4294966272  ;;  %s3002_s0 = sadd.s32 4294967294, %s2381_s30  }
 0x1a6   : > { %s1664_s15 = sand.u32 1, %s3002_s0  }
 0x1a7   : > { %s1665_s12 = scalar_lea.sflag [#allocation5], %s1664_s15 }
 0x1a8   : > { %2356 = dma.done.wait (%p2115_p7), %s1665_s12, 1040  }
 0x1a9   : > { %2358 = vsyncadd (%p2115_p7), %s1665_s12, 4294966256  ;;  %s1684_s9 = scalar_lea.sflag [#allocation8], %s1664_s15 }
 0x1aa   : > { %2360 = dma.done.wait (%p2115_p7), %s1684_s9, 32  }
 0x1ab   : > { %2362 = vsyncadd (%p2115_p7), %s1684_s9, 4294967264  ;;  %s1702_s13 = scalar_lea.sflag [#allocation11], %s1654_s20 }
 0x1ac   : > { %2364 = dma.done.wait (%p2115_p7), %s1702_s13, 16  }
 0x1ad   : > { %2366 = vsyncadd (%p2115_p7), %s1702_s13, 4294967280  ;;  %p28_p5 = scmp.ge.s32.totalorder %s2455_s11, 4   ;;  %s3003_s27 = smov %s2373_s28 }
 0x1ae   : > { %s3004_s28 = smov %s2377_s29  ;;  %s3005_s29 = smov %s2468_s14 }
 0x1af   : > { %s3006_s30 = smov %s2455_s11  ;;  %30 = sbr.rel (!%p28_p5) target bundleno = 13 (0xd), region = 161 }
 0x1b4   :  { %1707 = vsyncpa [#allocation3], 1 }
 0x1b5   :  { %1709 = vsyncpa [#allocation3 + $0x1], 1 }
 0x1b6   :  { %1710 = vsyncpa [#allocation5], 1 }
 0x1b7   :  { %1712 = vsyncpa [#allocation5 + $0x1], 1 }
 0x1b8   :  { %1713 = vsyncpa [#allocation8], 1 }
 0x1b9   :  { %1715 = vsyncpa [#allocation8 + $0x1], 1 }
 0x1ba   :  { %1716 = vsyncpa [#allocation11], 1 }
 0x1bb   :  { %1718 = vsyncpa [#allocation11 + $0x1], 1 }

</bundles_post_ra>
